<compile_context>
chip_gen: v7x
topology: tpu7x:2x2x1
jax: 0.10.0
libtpu: 0.0.40
codegen_flags: <defaults>
</compile_context>

<pallas_src>
import functools

import numpy as np
import jax
import jax.numpy as jnp
from jax.experimental import pallas as pl
from jax.experimental.pallas import tpu as pltpu


# ----------------------------- static conv plan -----------------------------
@functools.lru_cache(maxsize=None)
def _conv_plan(h, w):
    """Plan for the fixed conv stack (8x8/s4, 4x4/s2, 3x3/s1) on an HxW input.

    Row layouts:
      level-1 rows: (conv2-output row q, conv2 tap t2)  -> row = q*16 + t2
      level-2 rows: (conv3 output o3, conv3 tap p)      -> q   = o3*9 + p
    `dup` maps each level-1 row to its conv1 output position (for the host-side
    im2col gather).  mask1/S1 and mask2/S2 are the constant select / group-sum
    matrices used inside the kernel.
    """
    oh1, ow1 = (h - 8) // 4 + 1, (w - 8) // 4 + 1
    oh2, ow2 = (oh1 - 4) // 2 + 1, (ow1 - 4) // 2 + 1
    oh3, ow3 = oh2 - 2, ow2 - 2
    assert min(oh1, ow1, oh2, ow2, oh3, ow3) >= 1, "input too small for conv stack"
    n3 = oh3 * ow3            # conv3 output positions
    r2 = 9 * n3               # conv2 rows needed (one per (conv3 pos, conv3 tap))
    r1 = 16 * r2              # conv1 rows needed (one per (conv2 row, conv2 tap))

    dup = np.zeros((r1,), np.int32)
    for q in range(r2):
        o3, p = divmod(q, 9)
        kh3, kw3 = divmod(p, 3)
        oh, ow = divmod(o3, ow3)
        for t2 in range(16):
            kh2, kw2 = divmod(t2, 4)
            h1r = 2 * (oh + kh3) + kh2
            w1r = 2 * (ow + kw3) + kw2
            dup[q * 16 + t2] = h1r * ow1 + w1r

    ones = np.ones
    mask1 = np.tile(np.kron(np.eye(16, dtype=np.float32), ones((1, 32), np.float32)),
                    (r2, 1))                                         # (r1, 512)
    s1 = np.kron(np.eye(r2, dtype=np.float32), ones((1, 16), np.float32))   # (r2, r1)
    mask2 = np.tile(np.kron(np.eye(9, dtype=np.float32), ones((1, 64), np.float32)),
                    (n3, 1))                                         # (r2, 576)
    s2 = np.kron(np.eye(n3, dtype=np.float32), ones((1, 9), np.float32))    # (n3, r2)
    return dict(oh1=oh1, ow1=ow1, oh3=oh3, ow3=ow3, n3=n3, r2=r2, r1=r1,
                dup=dup, mask1=mask1, s1=s1, mask2=mask2, s2=s2)


# ------------------------------- fused kernel --------------------------------
def _qnet_fused_kernel(x1_ref, act_ref,
                       w1_ref, b1_ref, m1_ref, s1_ref,
                       w2_ref, b2_ref, m2_ref, s2_ref,
                       w3_ref, b3_ref,
                       wa_ref, ba_ref, w2s_ref, w2a_ref, bd2_ref, wh_ref, bh_ref,
                       out_ref, *, n3):
    f32 = jnp.float32
    bf16 = jnp.bfloat16

    # ---- conv1 (tap-replicated): one bf16 dot, f32 epilogue ----
    h1w = jnp.dot(x1_ref[0], w1_ref[...], preferred_element_type=f32)      # (r1, 512)
    h1w = jnp.maximum(h1w + b1_ref[...], 0.0) * m1_ref[...]                # bias+relu, keep own tap block
    # group-sum: pack each conv2 window (16 rows) into one lane-dense 512-wide row
    h1p = jnp.dot(s1_ref[...], h1w.astype(bf16), preferred_element_type=f32)   # (r2, 512)

    # ---- conv2 (tap-replicated along N): one bf16 dot with K=512 ----
    h2w = jnp.dot(h1p.astype(bf16), w2_ref[...], preferred_element_type=f32)   # (r2, 576)
    h2w = jnp.maximum(h2w + b2_ref[...], 0.0) * m2_ref[...]
    # group-sum: pack each conv3 window (9 rows) into one 576-wide row
    h2p = jnp.dot(s2_ref[...], h2w.astype(bf16), preferred_element_type=f32)   # (n3, 576)

    # ---- conv3: single K=576 bf16 dot; relu(relu(x)) == relu(x) covers QNet's extra relu ----
    s = jnp.maximum(jnp.dot(h2p.astype(bf16), w3_ref[...],
                            preferred_element_type=f32) + b3_ref[...], 0.0)    # (n3, 64)

    # ---- dense head: a = relu(act@Wa+ba); x = relu([s,a]@W2+b2); q = x@Wh+bh ----
    act = act_ref[0]                                                           # (1, A) bf16
    a = jnp.maximum(jnp.dot(act, wa_ref[...], preferred_element_type=f32)
                    + ba_ref[...], 0.0)                                        # (1, hid)
    if n3 == 1:
        xacc = jnp.dot(s.astype(bf16), w2s_ref[...], preferred_element_type=f32)
    else:
        # TODO(synk): large-frame path — pack s rows like the conv im2col instead of looping.
        xacc = jnp.dot(s[0:1].astype(bf16), w2s_ref[0:64], preferred_element_type=f32)
        for o in range(1, n3):
            xacc = xacc + jnp.dot(s[o:o + 1].astype(bf16),
                                  w2s_ref[o * 64:(o + 1) * 64],
                                  preferred_element_type=f32)
    xacc = xacc + jnp.dot(a.astype(bf16), w2a_ref[...], preferred_element_type=f32)
    xh = jnp.maximum(xacc + bd2_ref[...], 0.0)                                 # (1, hid)
    q = jnp.dot(xh.astype(bf16), wh_ref[...], preferred_element_type=f32) + bh_ref[...]
    out_ref[0] = q.astype(out_ref.dtype)


# -------------------------------- forward pass -------------------------------
def qnet_forward(params, state_nchw, action):
    """QNet forward (picture-input branch), fused into a single pallas_call."""
    B, C, H, W = state_nchw.shape
    A = action.shape[1]
    hid = params["wa"].shape[1]
    plan = _conv_plan(H, W)
    n3, r2, r1 = plan["n3"], plan["r2"], plan["r1"]
    oh1, ow1 = plan["oh1"], plan["ow1"]
    k1 = 8 * 8 * C

    # conv1 im2col of the raw image (pure data movement, fused by XLA), cast to
    # bf16 BEFORE the gather so the duplicated rows move at half width.
    x = jnp.transpose(state_nchw, (0, 2, 3, 1)).astype(jnp.bfloat16)       # NHWC
    cols = [x[:, i:i + 4 * oh1:4, j:j + 4 * ow1:4, :]
            for i in range(8) for j in range(8)]
    patches = jnp.concatenate(cols, axis=-1).reshape(B, oh1 * ow1, k1)
    x1 = jnp.take(patches, jnp.asarray(plan["dup"]), axis=1)               # (B, r1, k1) bf16

    act3 = action.astype(jnp.bfloat16).reshape(B, 1, A)

    # Weight packing (trace-time; all matmul operands bf16, biases f32).
    bf = jnp.bfloat16
    fb = lambda v: v.reshape(1, -1).astype(jnp.float32)
    w1rep = jnp.tile(params["w1"].reshape(k1, 32).astype(bf), (1, 16))     # (k1, 512)
    b1rep = jnp.tile(params["b1"], 16).reshape(1, -1).astype(jnp.float32)  # (1, 512)
    w2wide = jnp.tile(params["w2"].reshape(16 * 32, 64).astype(bf), (1, 9))  # (512, 576)
    b2rep = jnp.tile(params["b2"], 9).reshape(1, -1).astype(jnp.float32)   # (1, 576)
    w3p = params["w3"].reshape(9 * 64, 64).astype(bf)                      # (576, 64)
    w2d = params["w2d"]
    # PyTorch cat order is [state_features (NCHW flatten), action_branch]:
    w2s = (w2d[:64 * n3].reshape(64, n3, hid).transpose(1, 0, 2)
           .reshape(n3 * 64, hid).astype(bf))
    w2a = w2d[64 * n3:].astype(bf)
    mask1 = jnp.asarray(plan["mask1"], jnp.float32)                        # (r1, 512)
    s1 = jnp.asarray(plan["s1"], bf)                                       # (r2, r1)
    mask2 = jnp.asarray(plan["mask2"], jnp.float32)                        # (r2, 576)
    s2 = jnp.asarray(plan["s2"], bf)                                       # (n3, r2)

    kernel = functools.partial(_qnet_fused_kernel, n3=n3)
    cmap = lambda i: (0, 0)
    out = pl.pallas_call(
        kernel,
        out_shape=jax.ShapeDtypeStruct((B, 1, A), jnp.float32),
        grid=(B,),
        in_specs=[
            pl.BlockSpec((1, r1, k1), lambda i: (i, 0, 0)),     # conv1 im2col rows
            pl.BlockSpec((1, 1, A), lambda i: (i, 0, 0)),       # action
            pl.BlockSpec((k1, 16 * 32), cmap),                  # w1 (tap-replicated)
            pl.BlockSpec((1, 16 * 32), cmap),                   # b1 (tap-replicated)
            pl.BlockSpec((r1, 16 * 32), cmap),                  # conv2-tap select mask
            pl.BlockSpec((r2, r1), cmap),                       # conv2-window group sum
            pl.BlockSpec((16 * 32, 9 * 64), cmap),              # w2 (tap-replicated, K=512)
            pl.BlockSpec((1, 9 * 64), cmap),                    # b2 (tap-replicated)
            pl.BlockSpec((r2, 9 * 64), cmap),                   # conv3-tap select mask
            pl.BlockSpec((n3, r2), cmap),                       # conv3-window group sum
            pl.BlockSpec((9 * 64, 64), cmap),                   # w3 (K-packed, K=576)
            pl.BlockSpec((1, 64), cmap),                        # b3
            pl.BlockSpec((A, hid), cmap),                       # dense_a weight
            pl.BlockSpec((1, hid), cmap),                       # dense_a bias
            pl.BlockSpec((n3 * 64, hid), cmap),                 # dense2 weight (state part)
            pl.BlockSpec((hid, hid), cmap),                     # dense2 weight (action part)
            pl.BlockSpec((1, hid), cmap),                       # dense2 bias
            pl.BlockSpec((hid, A), cmap),                       # head1 weight
            pl.BlockSpec((1, A), cmap),                         # head1 bias
        ],
        out_specs=pl.BlockSpec((1, 1, A), lambda i: (i, 0, 0)),
        compiler_params=pltpu.CompilerParams(
            dimension_semantics=("parallel",),   # batch axis -> megacore / v7x 2 TCs
            vmem_limit_bytes=32 * 1024 * 1024,
        ),
    )(x1, act3, w1rep, b1rep, mask1, s1, w2wide, b2rep, mask2, s2,
      w3p, fb(params["b3"]), params["wa"].astype(bf), fb(params["ba"]),
      w2s, w2a, fb(params["b2d"]), params["wh"].astype(bf), fb(params["bh"]))
    return out.reshape(B, A)


# ------------------------------ parameter init -------------------------------
def init_qnet_params(key, *, in_channels=3, spatial=(36, 36), action_size=8,
                     hidden_size=256):
    ks = jax.random.split(key, 6)

    def xavier(k, fan_in, fan_out, shape):
        bound = float(np.sqrt(6.0 / (fan_in + fan_out)))
        return jax.random.uniform(k, shape, jnp.float32, -bound, bound)

    # Conv weights stored HWIO; xavier fans follow PyTorch's OIHW convention.
    w1 = xavier(ks[0], in_channels * 64, 32 * 64, (8, 8, in_channels, 32))
    w2 = xavier(ks[1], 32 * 16, 64 * 16, (4, 4, 32, 64))
    w3 = xavier(ks[2], 64 * 9, 64 * 9, (3, 3, 64, 64))
    s_out = 64 * _conv_plan(*spatial)["n3"]
    wa = xavier(ks[3], action_size, hidden_size, (action_size, hidden_size))
    w2d = xavier(ks[4], s_out + hidden_size, hidden_size,
                 (s_out + hidden_size, hidden_size))
    wh = xavier(ks[5], hidden_size, action_size, (hidden_size, action_size))
    zeros = lambda n: jnp.zeros((n,), jnp.float32)
    return dict(w1=w1, b1=zeros(32), w2=w2, b2=zeros(64), w3=w3, b3=zeros(64),
                wa=wa, ba=zeros(hidden_size), w2d=w2d, b2d=zeros(hidden_size),
                wh=wh, bh=zeros(action_size))


# ------------------------------ pure-JAX reference ---------------------------
def qnet_reference(params, state_nchw, action):
    hp = jax.lax.Precision.HIGHEST
    x = jnp.transpose(state_nchw, (0, 2, 3, 1))

    def conv(x, w, bias, stride):
        y = jax.lax.conv_general_dilated(
            x, w, window_strides=stride, padding="VALID",
            dimension_numbers=("NHWC", "HWIO", "NHWC"), precision=hp)
        return jax.nn.relu(y + bias)

    x = conv(x, params["w1"], params["b1"], (4, 4))
    x = conv(x, params["w2"], params["b2"], (2, 2))
    x = conv(x, params["w3"], params["b3"], (1, 1))
    s = jnp.transpose(x, (0, 3, 1, 2)).reshape(x.shape[0], -1)   # == x.view(B, -1)
    s = jax.nn.relu(s)
    a = jax.nn.relu(jnp.dot(action, params["wa"], precision=hp) + params["ba"])
    xc = jnp.concatenate([s, a], axis=1)
    xc = jax.nn.relu(jnp.dot(xc, params["w2d"], precision=hp) + params["b2d"])
    return jnp.dot(xc, params["wh"], precision=hp) + params["bh"]


if __name__ == "__main__":
    key = jax.random.PRNGKey(0)
    kp, kst, kac = jax.random.split(key, 3)

    # 36x36 image -> conv stack: 8x8 -> 3x3 -> 1x1 (64 features); action dim 8.
    B, C, H, W = 2, 3, 36, 36
    A, HID = 8, 256

    params = init_qnet_params(kp, in_channels=C, spatial=(H, W),
                              action_size=A, hidden_size=HID)
    state = jax.random.normal(kst, (B, C, H, W), jnp.float32)
    action = jax.random.normal(kac, (B, A), jnp.float32)

    q = jax.block_until_ready(jax.jit(qnet_forward)(params, state, action))
    assert q.shape == (B, A), q.shape

    q_ref = jax.block_until_ready(qnet_reference(params, state, action))
    assert np.allclose(np.asarray(q), np.asarray(q_ref), rtol=5e-2, atol=5e-2), (q, q_ref)
    print("KERNEL_OK")
</pallas_src>

<mosaic_0001>
module attributes {stable_mosaic.version = 11 : i64} {
  func.func @_qnet_fused_kernel(%arg0: i32, %arg1: memref<1x144x192xbf16, #tpu.memory_space<vmem>>, %arg2: memref<1x1x8xbf16, #tpu.memory_space<vmem>>, %arg3: memref<192x512xbf16, #tpu.memory_space<vmem>>, %arg4: memref<1x512xf32, #tpu.memory_space<vmem>>, %arg5: memref<144x512xf32, #tpu.memory_space<vmem>>, %arg6: memref<9x144xbf16, #tpu.memory_space<vmem>>, %arg7: memref<512x576xbf16, #tpu.memory_space<vmem>>, %arg8: memref<1x576xf32, #tpu.memory_space<vmem>>, %arg9: memref<9x576xf32, #tpu.memory_space<vmem>>, %arg10: memref<1x9xbf16, #tpu.memory_space<vmem>>, %arg11: memref<576x64xbf16, #tpu.memory_space<vmem>>, %arg12: memref<1x64xf32, #tpu.memory_space<vmem>>, %arg13: memref<8x256xbf16, #tpu.memory_space<vmem>>, %arg14: memref<1x256xf32, #tpu.memory_space<vmem>>, %arg15: memref<64x256xbf16, #tpu.memory_space<vmem>>, %arg16: memref<256x256xbf16, #tpu.memory_space<vmem>>, %arg17: memref<1x256xf32, #tpu.memory_space<vmem>>, %arg18: memref<256x8xbf16, #tpu.memory_space<vmem>>, %arg19: memref<1x8xf32, #tpu.memory_space<vmem>>, %arg20: memref<1x1x8xf32, #tpu.memory_space<vmem>>) attributes {dimension_semantics = [#tpu.dimension_semantics<parallel>], iteration_bounds = array<i64: 2>, scalar_prefetch = 0 : i64, scratch_operands = 0 : i64, tpu.core_type = #tpu.core_type<tc>, window_params = [{transform_indices = @transform_0, window_bounds = array<i64: 1, 144, 192>}, {transform_indices = @transform_1, window_bounds = array<i64: 1, 1, 8>}, {pipeline_mode = #tpu.pipeline_mode<synchronous>, transform_indices = @transform_2, window_bounds = array<i64: 192, 512>}, {pipeline_mode = #tpu.pipeline_mode<synchronous>, transform_indices = @transform_3, window_bounds = array<i64: 1, 512>}, {pipeline_mode = #tpu.pipeline_mode<synchronous>, transform_indices = @transform_4, window_bounds = array<i64: 144, 512>}, {pipeline_mode = #tpu.pipeline_mode<synchronous>, transform_indices = @transform_5, window_bounds = array<i64: 9, 144>}, {pipeline_mode = #tpu.pipeline_mode<synchronous>, transform_indices = @transform_6, window_bounds = array<i64: 512, 576>}, {pipeline_mode = #tpu.pipeline_mode<synchronous>, transform_indices = @transform_7, window_bounds = array<i64: 1, 576>}, {pipeline_mode = #tpu.pipeline_mode<synchronous>, transform_indices = @transform_8, window_bounds = array<i64: 9, 576>}, {pipeline_mode = #tpu.pipeline_mode<synchronous>, transform_indices = @transform_9, window_bounds = array<i64: 1, 9>}, {pipeline_mode = #tpu.pipeline_mode<synchronous>, transform_indices = @transform_10, window_bounds = array<i64: 576, 64>}, {pipeline_mode = #tpu.pipeline_mode<synchronous>, transform_indices = @transform_11, window_bounds = array<i64: 1, 64>}, {pipeline_mode = #tpu.pipeline_mode<synchronous>, transform_indices = @transform_12, window_bounds = array<i64: 8, 256>}, {pipeline_mode = #tpu.pipeline_mode<synchronous>, transform_indices = @transform_13, window_bounds = array<i64: 1, 256>}, {pipeline_mode = #tpu.pipeline_mode<synchronous>, transform_indices = @transform_14, window_bounds = array<i64: 64, 256>}, {pipeline_mode = #tpu.pipeline_mode<synchronous>, transform_indices = @transform_15, window_bounds = array<i64: 256, 256>}, {pipeline_mode = #tpu.pipeline_mode<synchronous>, transform_indices = @transform_16, window_bounds = array<i64: 1, 256>}, {pipeline_mode = #tpu.pipeline_mode<synchronous>, transform_indices = @transform_17, window_bounds = array<i64: 256, 8>}, {pipeline_mode = #tpu.pipeline_mode<synchronous>, transform_indices = @transform_18, window_bounds = array<i64: 1, 8>}, {transform_indices = @transform_19, window_bounds = array<i64: 1, 1, 8>}]} {
    %c0 = arith.constant 0 : index
    %c0_0 = arith.constant 0 : index
    %c0_1 = arith.constant 0 : index
    %0 = vector.load %arg1[%c0, %c0_0, %c0_1] : memref<1x144x192xbf16, #tpu.memory_space<vmem>>, vector<1x144x192xbf16>
    %1 = vector.shape_cast %0 : vector<1x144x192xbf16> to vector<144x192xbf16>
    %c0_2 = arith.constant 0 : index
    %c0_3 = arith.constant 0 : index
    %2 = vector.load %arg3[%c0_2, %c0_3] : memref<192x512xbf16, #tpu.memory_space<vmem>>, vector<192x512xbf16>
    %cst = arith.constant dense<0.000000e+00> : vector<144x512xf32>
    %3 = tpu.matmul %1, %2, %cst {dimension_numbers = #tpu.dot_dimension_numbers<[1], [0], [0], [1], [0, 0, 1, 1], [], []>} : vector<144x192xbf16>, vector<192x512xbf16>, vector<144x512xf32> -> vector<144x512xf32>
    %c0_4 = arith.constant 0 : index
    %c0_5 = arith.constant 0 : index
    %4 = vector.load %arg4[%c0_4, %c0_5] : memref<1x512xf32, #tpu.memory_space<vmem>>, vector<1x512xf32>
    %5 = vector.broadcast %4 : vector<1x512xf32> to vector<144x512xf32>
    %6 = arith.addf %3, %5 : vector<144x512xf32>
    %cst_6 = arith.constant 0.000000e+00 : f32
    %7 = vector.broadcast %cst_6 : f32 to vector<144x512xf32>
    %8 = arith.maximumf %6, %7 : vector<144x512xf32>
    %c0_7 = arith.constant 0 : index
    %c0_8 = arith.constant 0 : index
    %9 = vector.load %arg5[%c0_7, %c0_8] : memref<144x512xf32, #tpu.memory_space<vmem>>, vector<144x512xf32>
    %10 = arith.mulf %8, %9 : vector<144x512xf32>
    %c0_9 = arith.constant 0 : index
    %c0_10 = arith.constant 0 : index
    %11 = vector.load %arg6[%c0_9, %c0_10] : memref<9x144xbf16, #tpu.memory_space<vmem>>, vector<9x144xbf16>
    %12 = arith.truncf %10 : vector<144x512xf32> to vector<144x512xbf16>
    %cst_11 = arith.constant dense<0.000000e+00> : vector<9x512xf32>
    %13 = tpu.matmul %11, %12, %cst_11 {dimension_numbers = #tpu.dot_dimension_numbers<[1], [0], [0], [1], [0, 0, 1, 1], [], []>} : vector<9x144xbf16>, vector<144x512xbf16>, vector<9x512xf32> -> vector<9x512xf32>
    %14 = arith.truncf %13 : vector<9x512xf32> to vector<9x512xbf16>
    %c0_12 = arith.constant 0 : index
    %c0_13 = arith.constant 0 : index
    %15 = vector.load %arg7[%c0_12, %c0_13] : memref<512x576xbf16, #tpu.memory_space<vmem>>, vector<512x576xbf16>
    %cst_14 = arith.constant dense<0.000000e+00> : vector<9x576xf32>
    %16 = tpu.matmul %14, %15, %cst_14 {dimension_numbers = #tpu.dot_dimension_numbers<[1], [0], [0], [1], [0, 0, 1, 1], [], []>} : vector<9x512xbf16>, vector<512x576xbf16>, vector<9x576xf32> -> vector<9x576xf32>
    %c0_15 = arith.constant 0 : index
    %c0_16 = arith.constant 0 : index
    %17 = vector.load %arg8[%c0_15, %c0_16] : memref<1x576xf32, #tpu.memory_space<vmem>>, vector<1x576xf32>
    %18 = vector.broadcast %17 : vector<1x576xf32> to vector<9x576xf32>
    %19 = arith.addf %16, %18 : vector<9x576xf32>
    %cst_17 = arith.constant 0.000000e+00 : f32
    %20 = vector.broadcast %cst_17 : f32 to vector<9x576xf32>
    %21 = arith.maximumf %19, %20 : vector<9x576xf32>
    %c0_18 = arith.constant 0 : index
    %c0_19 = arith.constant 0 : index
    %22 = vector.load %arg9[%c0_18, %c0_19] : memref<9x576xf32, #tpu.memory_space<vmem>>, vector<9x576xf32>
    %23 = arith.mulf %21, %22 : vector<9x576xf32>
    %c0_20 = arith.constant 0 : index
    %c0_21 = arith.constant 0 : index
    %24 = vector.load %arg10[%c0_20, %c0_21] : memref<1x9xbf16, #tpu.memory_space<vmem>>, vector<1x9xbf16>
    %25 = arith.truncf %23 : vector<9x576xf32> to vector<9x576xbf16>
    %cst_22 = arith.constant dense<0.000000e+00> : vector<1x576xf32>
    %26 = tpu.matmul %24, %25, %cst_22 {dimension_numbers = #tpu.dot_dimension_numbers<[1], [0], [0], [1], [0, 0, 1, 1], [], []>} : vector<1x9xbf16>, vector<9x576xbf16>, vector<1x576xf32> -> vector<1x576xf32>
    %27 = arith.truncf %26 : vector<1x576xf32> to vector<1x576xbf16>
    %c0_23 = arith.constant 0 : index
    %c0_24 = arith.constant 0 : index
    %28 = vector.load %arg11[%c0_23, %c0_24] : memref<576x64xbf16, #tpu.memory_space<vmem>>, vector<576x64xbf16>
    %cst_25 = arith.constant dense<0.000000e+00> : vector<1x64xf32>
    %29 = tpu.matmul %27, %28, %cst_25 {dimension_numbers = #tpu.dot_dimension_numbers<[1], [0], [0], [1], [0, 0, 1, 1], [], []>} : vector<1x576xbf16>, vector<576x64xbf16>, vector<1x64xf32> -> vector<1x64xf32>
    %c0_26 = arith.constant 0 : index
    %c0_27 = arith.constant 0 : index
    %30 = vector.load %arg12[%c0_26, %c0_27] : memref<1x64xf32, #tpu.memory_space<vmem>>, vector<1x64xf32>
    %31 = arith.addf %29, %30 : vector<1x64xf32>
    %cst_28 = arith.constant 0.000000e+00 : f32
    %32 = vector.broadcast %cst_28 : f32 to vector<1x64xf32>
    %33 = arith.maximumf %31, %32 : vector<1x64xf32>
    %c0_29 = arith.constant 0 : index
    %c0_30 = arith.constant 0 : index
    %c0_31 = arith.constant 0 : index
    %34 = vector.load %arg2[%c0_29, %c0_30, %c0_31] : memref<1x1x8xbf16, #tpu.memory_space<vmem>>, vector<1x1x8xbf16>
    %35 = vector.shape_cast %34 : vector<1x1x8xbf16> to vector<1x8xbf16>
    %c0_32 = arith.constant 0 : index
    %c0_33 = arith.constant 0 : index
    %36 = vector.load %arg13[%c0_32, %c0_33] : memref<8x256xbf16, #tpu.memory_space<vmem>>, vector<8x256xbf16>
    %cst_34 = arith.constant dense<0.000000e+00> : vector<1x256xf32>
    %37 = tpu.matmul %35, %36, %cst_34 {dimension_numbers = #tpu.dot_dimension_numbers<[1], [0], [0], [1], [0, 0, 1, 1], [], []>} : vector<1x8xbf16>, vector<8x256xbf16>, vector<1x256xf32> -> vector<1x256xf32>
    %c0_35 = arith.constant 0 : index
    %c0_36 = arith.constant 0 : index
    %38 = vector.load %arg14[%c0_35, %c0_36] : memref<1x256xf32, #tpu.memory_space<vmem>>, vector<1x256xf32>
    %39 = arith.addf %37, %38 : vector<1x256xf32>
    %cst_37 = arith.constant 0.000000e+00 : f32
    %40 = vector.broadcast %cst_37 : f32 to vector<1x256xf32>
    %41 = arith.maximumf %39, %40 : vector<1x256xf32>
    %42 = arith.truncf %33 : vector<1x64xf32> to vector<1x64xbf16>
    %c0_38 = arith.constant 0 : index
    %c0_39 = arith.constant 0 : index
    %43 = vector.load %arg15[%c0_38, %c0_39] : memref<64x256xbf16, #tpu.memory_space<vmem>>, vector<64x256xbf16>
    %cst_40 = arith.constant dense<0.000000e+00> : vector<1x256xf32>
    %44 = tpu.matmul %42, %43, %cst_40 {dimension_numbers = #tpu.dot_dimension_numbers<[1], [0], [0], [1], [0, 0, 1, 1], [], []>} : vector<1x64xbf16>, vector<64x256xbf16>, vector<1x256xf32> -> vector<1x256xf32>
    %45 = arith.truncf %41 : vector<1x256xf32> to vector<1x256xbf16>
    %c0_41 = arith.constant 0 : index
    %c0_42 = arith.constant 0 : index
    %46 = vector.load %arg16[%c0_41, %c0_42] : memref<256x256xbf16, #tpu.memory_space<vmem>>, vector<256x256xbf16>
    %cst_43 = arith.constant dense<0.000000e+00> : vector<1x256xf32>
    %47 = tpu.matmul %45, %46, %cst_43 {dimension_numbers = #tpu.dot_dimension_numbers<[1], [0], [0], [1], [0, 0, 1, 1], [], []>} : vector<1x256xbf16>, vector<256x256xbf16>, vector<1x256xf32> -> vector<1x256xf32>
    %48 = arith.addf %44, %47 : vector<1x256xf32>
    %c0_44 = arith.constant 0 : index
    %c0_45 = arith.constant 0 : index
    %49 = vector.load %arg17[%c0_44, %c0_45] : memref<1x256xf32, #tpu.memory_space<vmem>>, vector<1x256xf32>
    %50 = arith.addf %48, %49 : vector<1x256xf32>
    %cst_46 = arith.constant 0.000000e+00 : f32
    %51 = vector.broadcast %cst_46 : f32 to vector<1x256xf32>
    %52 = arith.maximumf %50, %51 : vector<1x256xf32>
    %53 = arith.truncf %52 : vector<1x256xf32> to vector<1x256xbf16>
    %c0_47 = arith.constant 0 : index
    %c0_48 = arith.constant 0 : index
    %54 = vector.load %arg18[%c0_47, %c0_48] : memref<256x8xbf16, #tpu.memory_space<vmem>>, vector<256x8xbf16>
    %cst_49 = arith.constant dense<0.000000e+00> : vector<1x8xf32>
    %55 = tpu.matmul %53, %54, %cst_49 {dimension_numbers = #tpu.dot_dimension_numbers<[1], [0], [0], [1], [0, 0, 1, 1], [], []>} : vector<1x256xbf16>, vector<256x8xbf16>, vector<1x8xf32> -> vector<1x8xf32>
    %c0_50 = arith.constant 0 : index
    %c0_51 = arith.constant 0 : index
    %56 = vector.load %arg19[%c0_50, %c0_51] : memref<1x8xf32, #tpu.memory_space<vmem>>, vector<1x8xf32>
    %57 = arith.addf %55, %56 : vector<1x8xf32>
    %c0_52 = arith.constant 0 : index
    %c0_53 = arith.constant 0 : index
    %c0_54 = arith.constant 0 : index
    %58 = vector.load %arg20[%c0_52, %c0_53, %c0_54] : memref<1x1x8xf32, #tpu.memory_space<vmem>>, vector<1x1x8xf32>
    %59 = vector.shape_cast %58 : vector<1x1x8xf32> to vector<1x8xf32>
    %60 = vector.shape_cast %57 : vector<1x8xf32> to vector<1x1x8xf32>
    tpu.vector_store %arg20[%c0_52, %c0_53, %c0_54], %60 {strides = array<i32>} : memref<1x1x8xf32, #tpu.memory_space<vmem>>, vector<1x1x8xf32>,
    return
  }
  func.func @transform_0(%arg0: i32) -> (i32, i32, i32) {
    %c0_i32 = arith.constant 0 : i32
    %c0_i32_0 = arith.constant 0 : i32
    %c0_i32_1 = arith.constant 0 : i32
    return %arg0, %c0_i32, %c0_i32_0 : i32, i32, i32
  }
  func.func @transform_1(%arg0: i32) -> (i32, i32, i32) {
    %c0_i32 = arith.constant 0 : i32
    %c0_i32_0 = arith.constant 0 : i32
    %c0_i32_1 = arith.constant 0 : i32
    return %arg0, %c0_i32, %c0_i32_0 : i32, i32, i32
  }
  func.func @transform_2(%arg0: i32) -> (i32, i32) {
    %c0_i32 = arith.constant 0 : i32
    %c0_i32_0 = arith.constant 0 : i32
    %c0_i32_1 = arith.constant 0 : i32
    return %c0_i32, %c0_i32_0 : i32, i32
  }
  func.func @transform_3(%arg0: i32) -> (i32, i32) {
    %c0_i32 = arith.constant 0 : i32
    %c0_i32_0 = arith.constant 0 : i32
    %c0_i32_1 = arith.constant 0 : i32
    return %c0_i32, %c0_i32_0 : i32, i32
  }
  func.func @transform_4(%arg0: i32) -> (i32, i32) {
    %c0_i32 = arith.constant 0 : i32
    %c0_i32_0 = arith.constant 0 : i32
    %c0_i32_1 = arith.constant 0 : i32
    return %c0_i32, %c0_i32_0 : i32, i32
  }
  func.func @transform_5(%arg0: i32) -> (i32, i32) {
    %c0_i32 = arith.constant 0 : i32
    %c0_i32_0 = arith.constant 0 : i32
    %c0_i32_1 = arith.constant 0 : i32
    return %c0_i32, %c0_i32_0 : i32, i32
  }
  func.func @transform_6(%arg0: i32) -> (i32, i32) {
    %c0_i32 = arith.constant 0 : i32
    %c0_i32_0 = arith.constant 0 : i32
    %c0_i32_1 = arith.constant 0 : i32
    return %c0_i32, %c0_i32_0 : i32, i32
  }
  func.func @transform_7(%arg0: i32) -> (i32, i32) {
    %c0_i32 = arith.constant 0 : i32
    %c0_i32_0 = arith.constant 0 : i32
    %c0_i32_1 = arith.constant 0 : i32
    return %c0_i32, %c0_i32_0 : i32, i32
  }
  func.func @transform_8(%arg0: i32) -> (i32, i32) {
    %c0_i32 = arith.constant 0 : i32
    %c0_i32_0 = arith.constant 0 : i32
    %c0_i32_1 = arith.constant 0 : i32
    return %c0_i32, %c0_i32_0 : i32, i32
  }
  func.func @transform_9(%arg0: i32) -> (i32, i32) {
    %c0_i32 = arith.constant 0 : i32
    %c0_i32_0 = arith.constant 0 : i32
    %c0_i32_1 = arith.constant 0 : i32
    return %c0_i32, %c0_i32_0 : i32, i32
  }
  func.func @transform_10(%arg0: i32) -> (i32, i32) {
    %c0_i32 = arith.constant 0 : i32
    %c0_i32_0 = arith.constant 0 : i32
    %c0_i32_1 = arith.constant 0 : i32
    return %c0_i32, %c0_i32_0 : i32, i32
  }
  func.func @transform_11(%arg0: i32) -> (i32, i32) {
    %c0_i32 = arith.constant 0 : i32
    %c0_i32_0 = arith.constant 0 : i32
    %c0_i32_1 = arith.constant 0 : i32
    return %c0_i32, %c0_i32_0 : i32, i32
  }
  func.func @transform_12(%arg0: i32) -> (i32, i32) {
    %c0_i32 = arith.constant 0 : i32
    %c0_i32_0 = arith.constant 0 : i32
    %c0_i32_1 = arith.constant 0 : i32
    return %c0_i32, %c0_i32_0 : i32, i32
  }
  func.func @transform_13(%arg0: i32) -> (i32, i32) {
    %c0_i32 = arith.constant 0 : i32
    %c0_i32_0 = arith.constant 0 : i32
    %c0_i32_1 = arith.constant 0 : i32
    return %c0_i32, %c0_i32_0 : i32, i32
  }
  func.func @transform_14(%arg0: i32) -> (i32, i32) {
    %c0_i32 = arith.constant 0 : i32
    %c0_i32_0 = arith.constant 0 : i32
    %c0_i32_1 = arith.constant 0 : i32
    return %c0_i32, %c0_i32_0 : i32, i32
  }
  func.func @transform_15(%arg0: i32) -> (i32, i32) {
    %c0_i32 = arith.constant 0 : i32
    %c0_i32_0 = arith.constant 0 : i32
    %c0_i32_1 = arith.constant 0 : i32
    return %c0_i32, %c0_i32_0 : i32, i32
  }
  func.func @transform_16(%arg0: i32) -> (i32, i32) {
    %c0_i32 = arith.constant 0 : i32
    %c0_i32_0 = arith.constant 0 : i32
    %c0_i32_1 = arith.constant 0 : i32
    return %c0_i32, %c0_i32_0 : i32, i32
  }
  func.func @transform_17(%arg0: i32) -> (i32, i32) {
    %c0_i32 = arith.constant 0 : i32
    %c0_i32_0 = arith.constant 0 : i32
    %c0_i32_1 = arith.constant 0 : i32
    return %c0_i32, %c0_i32_0 : i32, i32
  }
  func.func @transform_18(%arg0: i32) -> (i32, i32) {
    %c0_i32 = arith.constant 0 : i32
    %c0_i32_0 = arith.constant 0 : i32
    %c0_i32_1 = arith.constant 0 : i32
    return %c0_i32, %c0_i32_0 : i32, i32
  }
  func.func @transform_19(%arg0: i32) -> (i32, i32, i32) {
    %c0_i32 = arith.constant 0 : i32
    %c0_i32_0 = arith.constant 0 : i32
    %c0_i32_1 = arith.constant 0 : i32
    return %arg0, %c0_i32, %c0_i32_0 : i32, i32, i32
  }
}

</mosaic_0001>

<bundles_post_ra>
// kernel: tile.38
= control target key start
LH: loop header
LB: loop body
LE: loop exit
PB: predicated region body
PF: predicated region fallthrough
CT: control target
= control target key end

     0   :  { %s28_s0 = inlined_call_operand.vmem [shape: f32[64], index: 0, kind: input, shape index: {}]   ;;  %s29_s1 = inlined_call_operand.vmem [shape: f32[9,64], index: 1, kind: output, shape index: {}]  }
   0x1   :  { %v4_v0 = vld [vmem:[%s28_s0] ss:$0 sm:$0xff] }
   0x2   :  { %5 = vst [vmem:[%s29_s1] sm:$0xff] %v4_v0  ;;  %8 = vst [vmem:[%s29_s1 + $0x8] sm:$0xff] %v4_v0 }

// kernel: tile.39
= control target key start
LH: loop header
LB: loop body
LE: loop exit
PB: predicated region body
PF: predicated region fallthrough
CT: control target
= control target key end

     0   :  { %vm3_vm0 = vcmask 523264   ;;  %s51_s8 = smov 64   ;;  %vm11_vm1 = vcmask 1048064   ;;  %s83_s0 = inlined_call_operand.vmem [shape: f32[9,64], index: 0, kind: input, shape index: {}]   ;;  %s84_s1 = inlined_call_operand.vmem [shape: f32[1,576], index: 1, kind: output, shape index: {}]  }
   0x1   :  { %v45_v0 = vld [vmem:[%s83_s0 + $0x1] ss:$2 sm:$0xf]   ;;  %v2_v1 = vld [vmem:[%s83_s0] ss:$2 sm:$0x1f]  }
   0x2   :  { %9 = vrot.lane.b32.xlu0 %v45_v0, %s51_s8  ;;  %4 = vst.msk [vmem:[#allocation0] ss:$8 sm:$0xf] %vm3_vm0, %v2_v1   ;;  %6 = vst.msk [vmem:[#allocation0 + $0x1c] sm:$0x10] %vm3_vm0, %v2_v1  }
   0x9   :  { %v37_v2 = vld [vmem:[#allocation0 + $0x20] sm:$0x1] }
   0xa   :  { %49 = vst [vmem:[%s84_s1 + $0x4] sm:$0x1] %v37_v2 }
  0x74   :  { %v10_v3 = vpop.permute.xlu0 %9  }
  0x75   :  { %12 = vst.msk [vmem:[#allocation0] ss:$8 sm:$0xf] %vm11_vm1, %v10_v3  }
  0x7c   :  { %v16_v4 = vld [vmem:[#allocation0] sm:$0x1]  ;;  %v20_v5 = vld [vmem:[#allocation0 + $0x8] sm:$0x1]  ;;  %v25_v6 = vld [vmem:[#allocation0 + $0x10] sm:$0x1] }
  0x7d   :  { %18 = vst [vmem:[%s84_s1] sm:$0x1] %v16_v4  ;;  %46 = vst [vmem:[%s84_s1 + $0x1] sm:$0x1] %v20_v5  ;;  %v31_v7 = vld [vmem:[#allocation0 + $0x18] sm:$0x1] }
  0x7e   :  { %47 = vst [vmem:[%s84_s1 + $0x2] sm:$0x1] %v25_v6  ;;  %48 = vst [vmem:[%s84_s1 + $0x3] sm:$0x1] %v31_v7 }

// kernel: tile.28
= control target key start
LH: loop header
LB: loop body
LE: loop exit
PB: predicated region body
PF: predicated region fallthrough
CT: control target
= control target key end

     0   :  { %s28_s0 = inlined_call_operand.vmem [shape: f32[32], index: 0, kind: input, shape index: {}]   ;;  %s29_s1 = inlined_call_operand.vmem [shape: f32[16,32], index: 1, kind: output, shape index: {}]  }
   0x1   :  { %v4_v0 = vld [vmem:[%s28_s0] ss:$0 sm:$0xff] }
   0x2   :  { %5 = vst [vmem:[%s29_s1] sm:$0xff] %v4_v0  ;;  %8 = vst [vmem:[%s29_s1 + $0x8] sm:$0xff] %v4_v0 }

// kernel: tile.29
= control target key start
LH: loop header
LB: loop body
LE: loop exit
PB: predicated region body
PF: predicated region fallthrough
CT: control target
= control target key end

     0   :  { %s57_s8 = smov 96   ;;  %vm3_vm0 = vcmask 261120   ;;  %s59_s15 = smov 64   ;;  %vm9_vm1 = vcmask 1048320   ;;  %vm15_vm2 = vcmask 785920   ;;  %vm21_vm3 = vcmask 523520   ;;  %s94_s0 = inlined_call_operand.vmem [shape: f32[16,32], index: 0, kind: input, shape index: {}]   ;;  %s95_s1 = inlined_call_operand.vmem [shape: f32[1,512], index: 1, kind: output, shape index: {}]  }
   0x1   :  { %v48_v0 = vld [vmem:[%s94_s0 + $0x3] ss:$4 sm:$0xf]   ;;  %v49_v1 = vld [vmem:[%s94_s0 + $0x2] ss:$4 sm:$0xf]  }
   0x2   :  { %7 = vrot.lane.b32.xlu0 %v48_v0, %s57_s8  ;;  %v50_v2 = vld [vmem:[%s94_s0 + $0x1] ss:$4 sm:$0xf]   ;;  %v2_v3 = vld [vmem:[%s94_s0] ss:$4 sm:$0xf]  }
   0x3   :  { %s58_s0 = smov 32   ;;  %4 = vst.msk [vmem:[#allocation0] ss:$8 sm:$0xf] %vm3_vm0, %v2_v3  }
   0x4   :  { %19 = vrot.lane.b32.xlu1 %v50_v2, %s58_s0 }
   0x6   :  { %13 = vrot.lane.b32.xlu0 %v49_v1, %s59_s15 }
  0x74   :  { %v8_v4 = vpop.permute.xlu0 %7  }
  0x75   :  { %10 = vst.msk [vmem:[#allocation0] ss:$8 sm:$0xf] %vm9_vm1, %v8_v4  }
  0x76   :  { %v20_v5 = vpop.permute.xlu1 %19  }
  0x78   :  { %v14_v6 = vpop.permute.xlu0 %13  }
  0x79   :  { %16 = vst.msk [vmem:[#allocation0] ss:$8 sm:$0xf] %vm15_vm2, %v14_v6  }
  0x7a   :  { %22 = vst.msk [vmem:[#allocation0] ss:$8 sm:$0xf] %vm21_vm3, %v20_v5  }
  0x81   :  { %v26_v7 = vld [vmem:[#allocation0] sm:$0x1]  ;;  %v30_v8 = vld [vmem:[#allocation0 + $0x8] sm:$0x1]  ;;  %v35_v9 = vld [vmem:[#allocation0 + $0x10] sm:$0x1] }
  0x82   :  { %28 = vst [vmem:[%s95_s1] sm:$0x1] %v26_v7  ;;  %51 = vst [vmem:[%s95_s1 + $0x1] sm:$0x1] %v30_v8  ;;  %v41_v10 = vld [vmem:[#allocation0 + $0x18] sm:$0x1] }
  0x83   :  { %52 = vst [vmem:[%s95_s1 + $0x2] sm:$0x1] %v35_v9  ;;  %53 = vst [vmem:[%s95_s1 + $0x3] sm:$0x1] %v41_v10 }

// kernel: qnet_forward.1
= control target key start
LH: loop header
LB: loop body
LE: loop exit
PB: predicated region body
PF: predicated region fallthrough
CT: control target
= control target key end

     0   :  { %s6878_s0 = inlined_call_operand.vmem [shape: bf16[2,144,192], index: 0, kind: input, shape index: {}]   ;;  %s6879_s1 = inlined_call_operand.vmem [shape: bf16[2,1,8], index: 1, kind: input, shape index: {}]   ;;  %s6880_s2 = inlined_call_operand.vmem [shape: bf16[192,512], index: 2, kind: input, shape index: {}]   ;;  %s6881_s3 = inlined_call_operand.vmem [shape: f32[1,512], index: 3, kind: input, shape index: {}]   ;;  %s6882_s4 = inlined_call_operand.vmem [shape: f32[144,512], index: 4, kind: input, shape index: {}]   ;;  %s6883_s5 = inlined_call_operand.vmem [shape: bf16[9,144], index: 5, kind: input, shape index: {}]   ;;  %s6884_s6 = inlined_call_operand.vmem [shape: bf16[512,576], index: 6, kind: input, shape index: {}]   ;;  %s6885_s7 = inlined_call_operand.vmem [shape: f32[1,576], index: 7, kind: input, shape index: {}]   ;;  %s6886_s8 = inlined_call_operand.vmem [shape: f32[9,576], index: 8, kind: input, shape index: {}]   ;;  %s6887_s9 = inlined_call_operand.vmem [shape: bf16[1,9], index: 9, kind: input, shape index: {}]   ;;  %s6888_s10 = inlined_call_operand.vmem [shape: bf16[576,64], index: 10, kind: input, shape index: {}]   ;;  %s6889_s11 = inlined_call_operand.vmem [shape: f32[1,64], index: 11, kind: input, shape index: {}]   ;;  %s6890_s12 = inlined_call_operand.vmem [shape: bf16[8,256], index: 12, kind: input, shape index: {}]   ;;  %s6891_s13 = inlined_call_operand.vmem [shape: f32[1,256], index: 13, kind: input, shape index: {}]   ;;  %s6892_s14 = inlined_call_operand.vmem [shape: bf16[64,256], index: 14, kind: input, shape index: {}]   ;;  %s6893_s15 = inlined_call_operand.vmem [shape: bf16[256,256], index: 15, kind: input, shape index: {}]   ;;  %s6894_s16 = inlined_call_operand.vmem [shape: f32[1,256], index: 16, kind: input, shape index: {}]   ;;  %s6895_s17 = inlined_call_operand.vmem [shape: bf16[256,8], index: 17, kind: input, shape index: {}]   ;;  %s6896_s18 = inlined_call_operand.vmem [shape: f32[1,8], index: 18, kind: input, shape index: {}]   ;;  %s6897_s19 = inlined_call_operand.hbm [shape: f32[2,1,8], index: 19, kind: output, shape index: {}]  }
   0x1   :  { %6908 = sst [smem:[#allocation12_spill]] %s6878_s0 }
   0x2   :  { %6909 = sst [smem:[#allocation13_spill]] %s6879_s1 }
   0x3   :  { %6910 = sst [smem:[#allocation14_spill]] %s6880_s2 }
   0x4   :  { %6911 = sst [smem:[#allocation15_spill]] %s6881_s3 }
   0x5   :  { %6912 = sst [smem:[#allocation16_spill]] %s6897_s19 }
   0x6   :  { %24 = vsyncpa [#allocation3], 0 }
   0x7   :  { %26 = vsyncpa [#allocation3 + $0x1], 0  ;;  %s5386_s0 = smov 0   ;;  %s5388_s30 = smov 0  }
   0x8   :  { %s5390_s20 = smov 0   ;;  %s5392_s21 = smov 0  }
   0x9 LB: > { %6913 = sst [smem:[#allocation5_spill]] %s5267_s0  ;;  %s5407_s1 = sadd.s32 4294967295, %s5279_s21   ;;  %s5279_s21 = sphi %s5392_s21, %s6931_s21   ;;  %s5275_s20 = sphi %s5390_s20, %s6933_s20   ;;  %s5271_s30 = sphi %s5388_s30, %s6935_s30   ;;  %s5267_s0 = sphi %s5386_s0, %s6934_s0  }
   0xa   : > { %6914 = sst [smem:[#allocation6_spill]] %s5275_s20  ;;  %s4225_s22 = sadd.s32 4294967294, %s5279_s21  }
   0xb   : > { %6915 = sst [smem:[#allocation7_spill]] %s5279_s21  ;;  %s5411_s2 = sadd.s32 1, %s5279_s21  }
   0xc   : > { %6916 = sst [smem:[#allocation8_spill]] %s5411_s2  ;;  %s448_s23 = sadd.s32 1, %s5275_s20 }
   0xd   : > { %s445_s24 = ssub.s32 %s5279_s21, %s5411_s2  ;;  %p458_p0 = scmp.ne.s32.totalorder %s5275_s20, %s5271_s30 }
   0xe   : > { %p446_p1 = scmp.eq.s32.totalorder %s445_s24, 0  ;;  %p459_p2 = scmp.eq.s32.totalorder %s5407_s1, 1 }
   0xf   : > { %p464_p3 = scmp.ne.s32.totalorder %s5271_s30, %s5267_s0  ;;  %p465_p4 = scmp.eq.s32.totalorder %s4225_s22, 1 }
  0x10   : > { %s5422_s25 = scalar_select %p446_p1, %s5275_s20, %s448_s23  }
  0x11   : > { %p5424_p5 = por %p459_p2, %p458_p0  ;;  %p5428_p6 = por %p465_p4, %p464_p3 }
  0x12   : > { %6917 = sst [smem:[#allocation9_spill]] %s5422_s25  ;;  %p4228_p7 = scmp.ge.s32.totalorder %s5279_s21, 1 }
  0x13   : > { %s6918_s3 = scalar_select %p5424_p5, 1, 0 }
  0x14   : > { %s6920_s26 = scalar_select %p5428_p6, 1, 0 }
  0x15   : > { %6919 = sst [smem:[#allocation10_spill]] %s6918_s3  ;;  %p548_p8 = scmp.lt.s32.totalorder %s5279_s21, 3 }
  0x16   : > { %6921 = sst [smem:[#allocation11_spill]] %s6920_s26 }
  0x17   : > { %p549_p9 = pnand %p4228_p7, %p548_p8 }
  0x18   : > { %s6922_s29 = sld [smem:[#allocation14_spill]] (!%p549_p9)  ;;  %p606_p10 = scmp.lt.s32.totalorder (!%p549_p9), %s5407_s1, 1  ;;  %vm1024_vm0 = vcmask (!%p549_p9), 523264   ;;  %vm1561_vm1 = vcmask (!%p549_p9), 130048   ;;  %vm5283_vm2 = vmmov (!%p549_p9), 0   ;;  %vm3000_vm3 = vcmask (!%p549_p9), 1043456  }
  0x19   : > { %552 = sbr.rel (%p549_p9) target bundleno = 1801 (0x709), region = 96  ;;  %s6923_s22 = sld [smem:[#allocation12_spill]] (!%p549_p9)  ;;  %vm3001_vm4 = vcmask (!%p549_p9), 1044480   ;;  %vm2996_vm5 = vcmask (!%p549_p9), 72704   ;;  %vm3578_vm6 = vcmask (!%p549_p9), 64512   ;;  %vm4146_vm7 = vcmask (!%p549_p9), 57344  }
  0x1a   : > { %s6924_s2 = sld [smem:[#allocation15_spill]] (!%p549_p9)  ;;  %s6925_s28 = sld [smem:[#allocation13_spill]] (!%p549_p9) }
  0x1b   : > { %s6927_s19 = sld [smem:[#allocation16_spill]] (!%p549_p9) }
  0x1e   : > { %v4777_v0 = vld [vmem:[%s6922_s29 + $0x4] ss:$16 sps:$4 sm:$0xff] (!%p549_p9)   ;;  %v4779_v1 = vld [vmem:[%s6922_s29] ss:$16 sps:$4 sm:$0xff] (!%p549_p9)   ;;  %v4819_v13 = vld [vmem:[%s6922_s29 + $0xc] ss:$16 sps:$4 sm:$0xff] (!%p549_p9)  }
  0x1f   : > { %1052 = vmatprep.subr.bf16.mxu0 (!%p549_p9), %v4777_v0  ;;  %v4780_v2 = vld [vmem:[%s6922_s29 + $0x24] ss:$16 sps:$4 sm:$0xff] (!%p549_p9)   ;;  %v4782_v3 = vld [vmem:[%s6922_s29 + $0x20] ss:$16 sps:$4 sm:$0xff] (!%p549_p9)   ;;  %v4821_v14 = vld [vmem:[%s6922_s29 + $0x8] ss:$16 sps:$4 sm:$0xff] (!%p549_p9)   ;;  %1175 = vmatprep.subr.bf16.mxu1 (!%p549_p9), %v4819_v13 }
  0x20   : > { %1053 = vmatpush1.bf16.msra.mxu0 %v4779_v1  ;;  %v4783_v4 = vld [vmem:[%s6922_s29 + $0x44] ss:$16 sps:$4 sm:$0xff]   ;;  %s5451_s26 = scalar_select %p606_p10, %s5407_s1, 1  ;;  %v4785_v5 = vld [vmem:[%s6922_s29 + $0x40] ss:$16 sps:$4 sm:$0xff]   ;;  %1176 = vmatpush1.bf16.msra.mxu1 %v4821_v14 }
  0x21   : > { %1054 = vmatprep.subr.bf16.mxu0 %v4780_v2  ;;  %v4786_v6 = vld [vmem:[%s6922_s29 + $0x64] ss:$16 sps:$4 sm:$0xff]   ;;  %v4788_v7 = vld [vmem:[%s6922_s29 + $0x60] ss:$16 sps:$4 sm:$0xff]   ;;  %v4825_v16 = vld [vmem:[%s6922_s29 + $0x2c] ss:$16 sps:$4 sm:$0xff]  }
  0x22   : > { %s4733_s20 = smul.u32 144, %s5451_s26  ;;  %v4789_v8 = vld [vmem:[%s6922_s29 + $0x84] ss:$16 sps:$4 sm:$0xff]   ;;  %v4791_v9 = vld [vmem:[%s6922_s29 + $0x80] ss:$16 sps:$4 sm:$0xff]   ;;  %1177 = vmatprep.subr.bf16.mxu1 %v4825_v16  ;;  %s613_s3 = scalar_lea.vmem %s6925_s28, %s5451_s26 }
  0x23   : > { %v4792_v10 = vld [vmem:[%s6922_s29 + $0xa4] ss:$16 sps:$4 sm:$0xff]   ;;  %v4794_v12 = vld [vmem:[%s6922_s29 + $0xa0] ss:$16 sps:$4 sm:$0xff]   ;;  %v4827_v17 = vld [vmem:[%s6922_s29 + $0x28] ss:$16 sps:$4 sm:$0xff]  }
  0x24   : > { %1055 = vmatpush1.bf16.msra.mxu0 %v4782_v3  ;;  %s5469_s23 = scalar_lea.vmem %s6923_s22, %s4733_s20  ;;  %v4795_v15 = vld [vmem:[%s6922_s29 + $0xc4] ss:$16 sps:$4 sm:$0xff]   ;;  %v4797_v18 = vld [vmem:[%s6922_s29 + $0xc0] ss:$16 sps:$4 sm:$0xff]   ;;  %v4828_v19 = vld [vmem:[%s6922_s29 + $0x4c] ss:$16 sps:$4 sm:$0xff]   ;;  %1178 = vmatpush1.bf16.msra.mxu1 %v4827_v17  ;;  %v683_v3 = vlaneseq }
  0x25   : > { %1056 = vmatprep.subr.bf16.mxu0 %v4783_v4  ;;  %v4815_v11 = vld [vmem:[%s5469_s23 + $0x4] ss:$8 sps:$4 sm:$0xff]   ;;  %v4830_v21 = vld [vmem:[%s6922_s29 + $0x48] ss:$16 sps:$4 sm:$0xff]   ;;  %v4800_v22 = vld [vmem:[%s6922_s29 + $0xe0] ss:$16 sps:$4 sm:$0xff]   ;;  %1179 = vmatprep.subr.bf16.mxu1 %v4828_v19 }
  0x26   : > { %4296 = vmatprep.mubr.msk.bf16.mxu0 %vm1024_vm0, %v4815_v11  ;;  %4305 = vmatprep.mubr.msk.bf16.mxu1 %vm1024_vm0, %v4815_v11  ;;  %v4798_v20 = vld [vmem:[%s6922_s29 + $0xe4] ss:$16 sps:$4 sm:$0xff]   ;;  %v4834_v23 = vld [vmem:[%s6922_s29 + $0x6c] ss:$16 sps:$4 sm:$0xff]   ;;  %v4836_v25 = vld [vmem:[%s6922_s29 + $0x68] ss:$16 sps:$4 sm:$0xff]  }
  0x27   : > { %v4801_v24 = vld [vmem:[%s6922_s29 + $0x104] ss:$16 sps:$4 sm:$0xff]   ;;  %v4803_v26 = vld [vmem:[%s6922_s29 + $0x100] ss:$16 sps:$4 sm:$0xff]   ;;  %v4837_v27 = vld [vmem:[%s6922_s29 + $0x8c] ss:$16 sps:$4 sm:$0xff]  }
  0x28   : > { %1057 = vmatpush1.bf16.msra.mxu0 %v4785_v5  ;;  %1180 = vmatpush1.bf16.msra.mxu1 %v4830_v21  ;;  %v4804_v28 = vld [vmem:[%s6922_s29 + $0x124] ss:$16 sps:$4 sm:$0xff]   ;;  %v4839_v29 = vld [vmem:[%s6922_s29 + $0x88] ss:$16 sps:$4 sm:$0xff]   ;;  %v4806_v30 = vld [vmem:[%s6922_s29 + $0x120] ss:$16 sps:$4 sm:$0xff]  }
  0x29   : > { %1058 = vmatprep.subr.bf16.mxu0 %v4786_v6  ;;  %1181 = vmatprep.subr.bf16.mxu1 %v4834_v23  ;;  %v4843_v31 = vld [vmem:[%s6922_s29 + $0xac] ss:$16 sps:$4 sm:$0xff]   ;;  %v4807_v32 = vld [vmem:[%s6922_s29 + $0x144] ss:$16 sps:$4 sm:$0xff]   ;;  %v4845_v33 = vld [vmem:[%s6922_s29 + $0xa8] ss:$16 sps:$4 sm:$0xff]  }
  0x2a   : > { %v4809_v34 = vld [vmem:[%s6922_s29 + $0x140] ss:$16 sps:$4 sm:$0xff]   ;;  %v4846_v35 = vld [vmem:[%s6922_s29 + $0xcc] ss:$16 sps:$4 sm:$0xff]   ;;  %v4810_v36 = vld [vmem:[%s6922_s29 + $0x164] ss:$16 sps:$4 sm:$0xff]  }
  0x2b   : > { %v4848_v37 = vld [vmem:[%s6922_s29 + $0xc8] ss:$16 sps:$4 sm:$0xff]   ;;  %v4812_v38 = vld [vmem:[%s6922_s29 + $0x160] ss:$16 sps:$4 sm:$0xff]   ;;  %v4852_v39 = vld [vmem:[%s6922_s29 + $0xec] ss:$16 sps:$4 sm:$0xff]  }
  0x2c   : > { %1059 = vmatpush1.bf16.msra.mxu0 %v4788_v7  ;;  %1182 = vmatpush1.bf16.msra.mxu1 %v4836_v25  ;;  %v4813_v40 = vld [vmem:[%s5469_s23] ss:$8 sps:$4 sm:$0xff]   ;;  %v4816_v42 = vld [vmem:[%s5469_s23 + $0x14] ss:$8 sps:$4 sm:$0xff]   ;;  %v4818_v46 = vld [vmem:[%s5469_s23 + $0x10] ss:$8 sps:$4 sm:$0xff]  }
  0x2d   : > { %1060 = vmatprep.subr.bf16.mxu0 %v4789_v8  ;;  %1183 = vmatprep.subr.bf16.mxu1 %v4837_v27  ;;  %v4854_v41 = vld [vmem:[%s6922_s29 + $0xe8] ss:$16 sps:$4 sm:$0xff]   ;;  %v4855_v43 = vld [vmem:[%s6922_s29 + $0x10c] ss:$16 sps:$4 sm:$0xff]   ;;  %v5627_v4 = vshrl.u32 %v683_v3, 7  ;;  %v1386_v3 = vld [vmem:[%s6882_s4 + $0x80] sm:$0xff] }
  0x2e   : > { %v4857_v44 = vld [vmem:[%s6922_s29 + $0x108] ss:$16 sps:$4 sm:$0xff]   ;;  %v4861_v45 = vld [vmem:[%s6922_s29 + $0x12c] ss:$16 sps:$4 sm:$0xff]   ;;  %v681_v6 = vld [vmem:[%s6924_s2] sm:$0xf] }
  0x2f   : > { %v4863_v47 = vld [vmem:[%s6922_s29 + $0x128] ss:$16 sps:$4 sm:$0xff]   ;;  %v4822_v48 = vld [vmem:[%s5469_s23 + $0x24] ss:$8 sps:$4 sm:$0xff]   ;;  %v4831_v54 = vld [vmem:[%s5469_s23 + $0x34] ss:$8 sps:$4 sm:$0xff]  }
  0x30   : > { %1061 = vmatpush1.bf16.msra.mxu0 %v4791_v9  ;;  %1184 = vmatpush1.bf16.msra.mxu1 %v4839_v29  ;;  %v4864_v49 = vld [vmem:[%s6922_s29 + $0x14c] ss:$16 sps:$4 sm:$0xff]   ;;  %v4866_v50 = vld [vmem:[%s6922_s29 + $0x148] ss:$16 sps:$4 sm:$0xff]   ;;  %v5630_v5 = vsub.s32 0, %v5627_v4  ;;  %v5636_v7 = vsub.s32 1, %v5627_v4 }
  0x31   : > { %1062 = vmatprep.subr.bf16.mxu0 %v4792_v10  ;;  %1185 = vmatprep.subr.bf16.mxu1 %v4843_v31  ;;  %v4870_v51 = vld [vmem:[%s6922_s29 + $0x16c] ss:$16 sps:$4 sm:$0xff]   ;;  %v4824_v52 = vld [vmem:[%s5469_s23 + $0x20] ss:$8 sps:$4 sm:$0xff]   ;;  %v4833_v55 = vld [vmem:[%s5469_s23 + $0x30] ss:$8 sps:$4 sm:$0xff]  }
  0x32   : > { %v4872_v53 = vld [vmem:[%s6922_s29 + $0x168] ss:$16 sps:$4 sm:$0xff]   ;;  %v4840_v56 = vld [vmem:[%s5469_s23 + $0x44] ss:$8 sps:$4 sm:$0xff]   ;;  %v4849_v58 = vld [vmem:[%s5469_s23 + $0x54] ss:$8 sps:$4 sm:$0xff]   ;;  %v5639_v8 = vrot.slane %v681_v6, %v5630_v5  ;;  %v5642_v9 = vrot.slane %v681_v6, %v5636_v7 }
  0x33   : > { %v4842_v57 = vld [vmem:[%s5469_s23 + $0x40] ss:$8 sps:$4 sm:$0xff]   ;;  %v4851_v59 = vld [vmem:[%s5469_s23 + $0x50] ss:$8 sps:$4 sm:$0xff]   ;;  %v4858_v60 = vld [vmem:[%s5469_s23 + $0x64] ss:$8 sps:$4 sm:$0xff]  }
  0x34   : > { %1063 = vmatpush1.bf16.msra.mxu0 %v4794_v12  ;;  %1186 = vmatpush1.bf16.msra.mxu1 %v4845_v33  ;;  %v4860_v61 = vld [vmem:[%s5469_s23 + $0x60] ss:$8 sps:$4 sm:$0xff]   ;;  %v4867_v62 = vld [vmem:[%s5469_s23 + $0x74] ss:$8 sps:$4 sm:$0xff]   ;;  %v4869_v63 = vld [vmem:[%s5469_s23 + $0x70] ss:$8 sps:$4 sm:$0xff]  }
  0x35   : > { %1064 = vmatprep.subr.bf16.mxu0 %v4795_v15  ;;  %1187 = vmatprep.subr.bf16.mxu1 %v4846_v35  ;;  %v4873_v0 = vld [vmem:[%s5469_s23 + $0x84] ss:$8 sps:$4 sm:$0xff]   ;;  %v4875_v1 = vld [vmem:[%s5469_s23 + $0x80] ss:$8 sps:$4 sm:$0xff]   ;;  %s4579_s23 = sshll.u32 %s5407_s1, 4  ;;  %s5285_s28 = smov [#allocation2]  }
  0x36   : > { %v4878_v2 = vld [vmem:[%s6883_s5 + $0x4] ss:$8 sps:$4 sm:$0x1f]   ;;  %s6836_s21 = scalar_lea.hbm %s6927_s19, %s4579_s23  ;;  %s5221_s22 = sshll.u32 %s5285_s28, 4  ;;  %s5222_s22 = int_to_ptr.vmem [resolvable:$false] %s5221_s22 }
  0x37   : > { %s5223_s25 = scalar_lea.vmem %s5222_s22, 32 }
  0x38   : > { %1065 = vmatpush1.bf16.msra.mxu0 %v4797_v18  ;;  %1188 = vmatpush1.bf16.msra.mxu1 %v4848_v37  ;;  %v1370_v18 = vld [vmem:[%s6882_s4] sm:$0xff] }
  0x39   : > { %1066 = vmatprep.subr.bf16.mxu0 %v4798_v20  ;;  %1189 = vmatprep.subr.bf16.mxu1 %v4852_v39  ;;  %v1374_v20 = vld [vmem:[%s6882_s4 + $0x20] sm:$0xff] }
  0x3c   : > { %1067 = vmatpush1.bf16.msra.mxu0 %v4800_v22  ;;  %1190 = vmatpush1.bf16.msra.mxu1 %v4854_v41  ;;  %v1371_v22 = vld [vmem:[%s6882_s4 + $0x8] sm:$0xff] }
  0x3d   : > { %1068 = vmatprep.subr.bf16.mxu0 %v4801_v24  ;;  %1191 = vmatprep.subr.bf16.mxu1 %v4855_v43  ;;  %v1375_v24 = vld [vmem:[%s6882_s4 + $0x28] sm:$0xff] }
  0x40   : > { %1069 = vmatpush1.bf16.msra.mxu0 %v4803_v26  ;;  %1192 = vmatpush1.bf16.msra.mxu1 %v4857_v44  ;;  %v693_v44 = vsub.s32 2, %v5627_v4 }
  0x41   : > { %1070 = vmatprep.subr.bf16.mxu0 %v4804_v28  ;;  %1193 = vmatprep.subr.bf16.mxu1 %v4861_v45  ;;  %v1379_v45 = vld [vmem:[%s6882_s4 + $0x48] sm:$0xff] }
  0x44   : > { %1071 = vmatpush1.bf16.msra.mxu0 %v4806_v30  ;;  %1194 = vmatpush1.bf16.msra.mxu1 %v4863_v47  ;;  %v1383_v47 = vld [vmem:[%s6882_s4 + $0x68] sm:$0xff] }
  0x45   : > { %1072 = vmatprep.subr.bf16.mxu0 %v4807_v32  ;;  %1195 = vmatprep.subr.bf16.mxu1 %v4864_v49 }
  0x48   : > { %1073 = vmatpush1.bf16.msra.mxu0 %v4809_v34  ;;  %1196 = vmatpush1.bf16.msra.mxu1 %v4866_v50 }
  0x49   : > { %1074 = vmatprep.subr.bf16.mxu0 %v4810_v36  ;;  %1197 = vmatprep.subr.bf16.mxu1 %v4870_v51 }
  0x4c   : > { %1075 = vmatpush1.bf16.msra.mxu0 %v4812_v38  ;;  %1198 = vmatpush1.bf16.msra.mxu1 %v4872_v53 }
  0x4f   : > { %1085 = vmatmul.mubr.bf16.vlgmr.msra.gmra.mrb[0].mxu0 %v4813_v40  ;;  %1208 = vmatmul.mubr.bf16.vlgmr.msra.gmra.mrb[0].mxu1 %v4813_v40  ;;  %v1378_v40 = vld [vmem:[%s6882_s4 + $0x40] sm:$0xff] }
  0x50   : > { %4297 = vmatprep.mubr.msk.bf16.mxu0 %vm1024_vm0, %v4816_v42  ;;  %4306 = vmatprep.mubr.msk.bf16.mxu1 %vm1024_vm0, %v4816_v42  ;;  %v1382_v42 = vld [vmem:[%s6882_s4 + $0x60] sm:$0xff] }
  0x57   : > { %1095 = vmatmul.mubr.bf16.gmra.mrb[4].mxu0 %v4818_v46  ;;  %1218 = vmatmul.mubr.bf16.gmra.mrb[4].mxu1 %v4818_v46 }
  0x58   : > { %4298 = vmatprep.mubr.msk.bf16.mxu0 %vm1024_vm0, %v4822_v48  ;;  %4307 = vmatprep.mubr.msk.bf16.mxu1 %vm1024_vm0, %v4822_v48  ;;  %v697_v48 = vsub.s32 3, %v5627_v4 }
  0x5f   : > { %1105 = vmatmul.mubr.bf16.gmra.mrb[8].mxu0 %v4824_v52  ;;  %1228 = vmatmul.mubr.bf16.gmra.mrb[8].mxu1 %v4824_v52 }
  0x60   : > { %4299 = vmatprep.mubr.msk.bf16.mxu0 %vm1024_vm0, %v4831_v54  ;;  %4308 = vmatprep.mubr.msk.bf16.mxu1 %vm1024_vm0, %v4831_v54 }
  0x67   : > { %1115 = vmatmul.mubr.bf16.gmra.mrb[12].mxu0 %v4833_v55  ;;  %1238 = vmatmul.mubr.bf16.gmra.mrb[12].mxu1 %v4833_v55  ;;  %v5680_v55 = vrot.slane %v681_v6, %v693_v44 }
  0x68   : > { %4300 = vmatprep.mubr.msk.bf16.mxu0 %vm1024_vm0, %v4840_v56  ;;  %4309 = vmatprep.mubr.msk.bf16.mxu1 %vm1024_vm0, %v4840_v56 }
  0x6f   : > { %1125 = vmatmul.mubr.bf16.gmra.mrb[16].mxu0 %v4842_v57  ;;  %1248 = vmatmul.mubr.bf16.gmra.mrb[16].mxu1 %v4842_v57 }
  0x70   : > { %4301 = vmatprep.mubr.msk.bf16.mxu0 %vm1024_vm0, %v4849_v58  ;;  %4310 = vmatprep.mubr.msk.bf16.mxu1 %vm1024_vm0, %v4849_v58 }
  0x77   : > { %1135 = vmatmul.mubr.bf16.gmra.mrb[20].mxu0 %v4851_v59  ;;  %1258 = vmatmul.mubr.bf16.gmra.mrb[20].mxu1 %v4851_v59  ;;  %v5685_v59 = vrot.slane %v681_v6, %v697_v48 }
  0x78   : > { %4302 = vmatprep.mubr.msk.bf16.mxu0 %vm1024_vm0, %v4858_v60  ;;  %4311 = vmatprep.mubr.msk.bf16.mxu1 %vm1024_vm0, %v4858_v60 }
  0x7f   : > { %1145 = vmatmul.mubr.bf16.gmra.mrb[24].mxu0 %v4860_v61  ;;  %1268 = vmatmul.mubr.bf16.gmra.mrb[24].mxu1 %v4860_v61 }
  0x80   : > { %4303 = vmatprep.mubr.msk.bf16.mxu0 %vm1024_vm0, %v4867_v62  ;;  %4312 = vmatprep.mubr.msk.bf16.mxu1 %vm1024_vm0, %v4867_v62 }
  0x87   : > { %1155 = vmatmul.mubr.bf16.gmra.mrb[28].mxu0 %v4869_v63  ;;  %1278 = vmatmul.mubr.bf16.gmra.mrb[28].mxu1 %v4869_v63 }
  0x88   : > { %4304 = vmatprep.mubr.msk.bf16.mxu0 %vm1024_vm0, %v4873_v0  ;;  %4313 = vmatprep.mubr.msk.bf16.mxu1 %vm1024_vm0, %v4873_v0 }
  0x8f   : > { %1165 = vmatmul.mubr.bf16.gmra.mrb[32].mxu0 %v4875_v1  ;;  %1288 = vmatmul.mubr.bf16.gmra.mrb[32].mxu1 %v4875_v1 }
  0x90   : > { %4316 = vmatprep.mubr.msk.bf16.mxu0 %vm1561_vm1, %v4878_v2  ;;  %4317 = vmatprep.mubr.msk.bf16.mxu1 %vm1561_vm1, %v4878_v2 }
 0x122   : > { %v1086_v10 = vpop.f32.mrb[0].mxu0  ;;  %v1209_v2 = vpop.f32.mrb[0].mxu1 }
 0x123   : > { %v1087_v11 = vadd.f32 %v1086_v10, %v5639_v8  ;;  %v1088_v12 = vpop.f32.mrb[1].mxu0 }
 0x124   : > { %v1089_v13 = vadd.f32 %v1088_v12, %v5642_v9  ;;  %v1090_v14 = vpop.f32.mrb[2].mxu0  ;;  %v1210_v12 = vadd.f32 %v1209_v2, %v5680_v55 }
 0x125   : > { %v1298_v15 = vmax.f32 %v1087_v11, 0.0  ;;  %v1091_v16 = vadd.f32 %v1090_v14, %v5639_v8  ;;  %v1092_v17 = vpop.f32.mrb[3].mxu0  ;;  %v1390_v11 = vld [vmem:[%s6882_s4 + $0xa0] sm:$0xff]  ;;  %v1387_v14 = vld [vmem:[%s6882_s4 + $0x88] sm:$0xff] }
 0x126   : > { %v1299_v19 = vmax.f32 %v1089_v13, 0.0  ;;  %v1093_v21 = vadd.f32 %v1092_v17, %v5642_v9  ;;  %v1211_v13 = vpop.f32.mrb[1].mxu1  ;;  %v1372_v17 = vld [vmem:[%s6882_s4 + $0x10] sm:$0xff] }
 0x127   : > { %v1302_v23 = vmax.f32 %v1091_v16, 0.0  ;;  %v1442_v26 = vmul.f32 %v1370_v18, %v1298_v15  ;;  %v1391_v16 = vld [vmem:[%s6882_s4 + $0xa8] sm:$0xff]  ;;  %v1212_v18 = vadd.f32 %v1211_v13, %v5685_v59 }
 0x128   : > { %v1303_v25 = vmax.f32 %v1093_v21, 0.0  ;;  %v1443_v28 = vmul.f32 %v1371_v22, %v1299_v19  ;;  %v1213_v19 = vpop.f32.mrb[2].mxu1  ;;  %v1300_v21 = vmax.f32 %v1210_v12, 0.0  ;;  %v1373_v22 = vld [vmem:[%s6882_s4 + $0x18] sm:$0xff] }
 0x129   : > { %v1446_v27 = vmul.f32 %v1374_v20, %v1302_v23  ;;  %v1214_v23 = vadd.f32 %v1213_v19, %v5680_v55 }
 0x12a   : > { %v1447_v29 = vmul.f32 %v1375_v24, %v1303_v25  ;;  %v1096_v30 = vpop.f32.mrb[4].mxu0  ;;  %v1215_v24 = vpop.f32.mrb[3].mxu1 }
 0x12b   : > { %v1516_v31 = vpack.c.bf16 %v1446_v27, %v1442_v26  ;;  %v1097_v32 = vadd.f32 %v1096_v30, %v5639_v8  ;;  %v1098_v33 = vpop.f32.mrb[5].mxu0  ;;  %v1301_v27 = vmax.f32 %v1212_v18, 0.0 }
 0x12c   : > { %v1099_v34 = vadd.f32 %v1098_v33, %v5642_v9  ;;  %v1100_v35 = vpop.f32.mrb[6].mxu0  ;;  %v1517_v36 = vpack.c.bf16 %v1447_v29, %v1443_v28  ;;  %v1376_v28 = vld [vmem:[%s6882_s4 + $0x30] sm:$0xff]  ;;  %v1216_v29 = vadd.f32 %v1215_v24, %v5685_v59  ;;  %v1444_v33 = vmul.f32 %v1372_v17, %v1300_v21  ;;  %v1385_v24 = vld [vmem:[%s6882_s4 + $0x78] sm:$0xff] }
 0x12d   : > { %v1306_v37 = vmax.f32 %v1097_v32, 0.0  ;;  %v1101_v38 = vadd.f32 %v1100_v35, %v5639_v8  ;;  %v1102_v39 = vpop.f32.mrb[7].mxu0  ;;  %v1377_v35 = vld [vmem:[%s6882_s4 + $0x38] sm:$0xff]  ;;  %v1384_v17 = vld [vmem:[%s6882_s4 + $0x70] sm:$0xff] }
 0x12e   : > { %v1307_v41 = vmax.f32 %v1099_v34, 0.0  ;;  %v1103_v43 = vadd.f32 %v1102_v39, %v5642_v9  ;;  %1565 = vmatprep.subr.bf16.mxu0 %v1517_v36  ;;  %v1304_v34 = vmax.f32 %v1214_v23, 0.0  ;;  %v1445_v39 = vmul.f32 %v1373_v22, %v1301_v27 }
 0x12f   : > { %v1310_v46 = vmax.f32 %v1101_v38, 0.0  ;;  %1566 = vmatpush1.bf16.msra.mxu0 %v1516_v31  ;;  %v1450_v50 = vmul.f32 %v1378_v40, %v1306_v37  ;;  %v1305_v40 = vmax.f32 %v1216_v29, 0.0 }
 0x130   : > { %v1311_v49 = vmax.f32 %v1103_v43, 0.0  ;;  %v1451_v52 = vmul.f32 %v1379_v45, %v1307_v41  ;;  %v1448_v45 = vmul.f32 %v1376_v28, %v1304_v34 }
 0x131   : > { %v1454_v51 = vmul.f32 %v1382_v42, %v1310_v46 }
 0x132   : > { %v1455_v53 = vmul.f32 %v1383_v47, %v1311_v49  ;;  %v1106_v54 = vpop.f32.mrb[8].mxu0 }
 0x133   : > { %v1520_v56 = vpack.c.bf16 %v1454_v51, %v1450_v50  ;;  %v1107_v57 = vadd.f32 %v1106_v54, %v5639_v8  ;;  %v1108_v58 = vpop.f32.mrb[9].mxu0  ;;  %v1449_v50 = vmul.f32 %v1377_v35, %v1305_v40  ;;  %v1219_v51 = vpop.f32.mrb[4].mxu1  ;;  %v1398_v54 = vld [vmem:[%s6882_s4 + $0xe0] sm:$0xff] }
 0x134   : > { %v1109_v60 = vadd.f32 %v1108_v58, %v5642_v9  ;;  %v1110_v61 = vpop.f32.mrb[10].mxu0  ;;  %v1521_v62 = vpack.c.bf16 %v1455_v53, %v1451_v52  ;;  %v1394_v52 = vld [vmem:[%s6882_s4 + $0xc0] sm:$0xff]  ;;  %v1220_v58 = vadd.f32 %v1219_v51, %v5680_v55  ;;  %v1388_v51 = vld [vmem:[%s6882_s4 + $0x90] sm:$0xff] }
 0x135   : > { %v1314_v63 = vmax.f32 %v1107_v57, 0.0  ;;  %v1111_v0 = vadd.f32 %v1110_v61, %v5639_v8  ;;  %v1112_v1 = vpop.f32.mrb[11].mxu0  ;;  %v1518_v57 = vpack.c.bf16 %v1448_v45, %v1444_v33  ;;  %v1395_v61 = vld [vmem:[%s6882_s4 + $0xc8] sm:$0xff] }
 0x136   : > { %v1315_v10 = vmax.f32 %v1109_v60, 0.0  ;;  %v1113_v6 = vadd.f32 %v1112_v1, %v5642_v9  ;;  %1567 = vmatprep.subr.bf16.mxu0 %v1521_v62  ;;  %v1221_v60 = vpop.f32.mrb[5].mxu1 }
 0x137   : > { %v1318_v15 = vmax.f32 %v1111_v0, 0.0  ;;  %1568 = vmatpush1.bf16.msra.mxu0 %v1520_v56  ;;  %v1458_v25 = vmul.f32 %v1386_v3, %v1314_v63  ;;  %v1399_v63 = vld [vmem:[%s6882_s4 + $0xe8] sm:$0xff]  ;;  %v1380_v0 = vld [vmem:[%s6882_s4 + $0x50] sm:$0xff]  ;;  %v1222_v1 = vadd.f32 %v1221_v60, %v5685_v59  ;;  %v1223_v2 = vpop.f32.mrb[6].mxu1  ;;  %v1519_v3 = vpack.c.bf16 %v1449_v50, %v1445_v39  ;;  %v1402_v39 = vld [vmem:[%s6882_s4 + $0x100] sm:$0xff] }
 0x138   : > { %v1319_v20 = vmax.f32 %v1113_v6, 0.0  ;;  %v1459_v30 = vmul.f32 %v1387_v14, %v1315_v10  ;;  %v1381_v6 = vld [vmem:[%s6882_s4 + $0x58] sm:$0xff]  ;;  %v1224_v12 = vadd.f32 %v1223_v2, %v5680_v55  ;;  %v1225_v13 = vpop.f32.mrb[7].mxu1  ;;  %v1407_v50 = vld [vmem:[%s6882_s4 + $0x128] sm:$0xff] }
 0x139   : > { %v1462_v26 = vmul.f32 %v1390_v11, %v1318_v15  ;;  %v1308_v11 = vmax.f32 %v1220_v58, 0.0  ;;  %v1226_v18 = vadd.f32 %v1225_v13, %v5685_v59  ;;  %1608 = vmatprep.subr.bf16.mxu1 %v1519_v3  ;;  %v1389_v58 = vld [vmem:[%s6882_s4 + $0x98] sm:$0xff] }
 0x13a   : > { %v1463_v31 = vmul.f32 %v1391_v16, %v1319_v20  ;;  %v1116_v32 = vpop.f32.mrb[12].mxu0  ;;  %v1309_v16 = vmax.f32 %v1222_v1, 0.0  ;;  %v1312_v23 = vmax.f32 %v1224_v12, 0.0  ;;  %1609 = vmatpush1.bf16.msra.mxu1 %v1518_v57  ;;  %v1392_v1 = vld [vmem:[%s6882_s4 + $0xb0] sm:$0xff]  ;;  %v1393_v13 = vld [vmem:[%s6882_s4 + $0xb8] sm:$0xff] }
 0x13b   : > { %v1524_v36 = vpack.c.bf16 %v1462_v26, %v1458_v25  ;;  %v1117_v37 = vadd.f32 %v1116_v32, %v5639_v8  ;;  %v1118_v38 = vpop.f32.mrb[13].mxu0  ;;  %v1452_v22 = vmul.f32 %v1380_v0, %v1308_v11  ;;  %v1313_v29 = vmax.f32 %v1226_v18, 0.0 }
 0x13c   : > { %v1119_v41 = vadd.f32 %v1118_v38, %v5642_v9  ;;  %v1120_v42 = vpop.f32.mrb[14].mxu0  ;;  %v1525_v43 = vpack.c.bf16 %v1463_v31, %v1459_v30  ;;  %v1453_v28 = vmul.f32 %v1381_v6, %v1309_v16  ;;  %v1456_v33 = vmul.f32 %v1384_v17, %v1312_v23  ;;  %v1229_v38 = vpop.f32.mrb[8].mxu1 }
 0x13d   : > { %v1322_v46 = vmax.f32 %v1117_v37, 0.0  ;;  %v1121_v47 = vadd.f32 %v1120_v42, %v5639_v8  ;;  %v1122_v49 = vpop.f32.mrb[15].mxu0  ;;  %v1457_v37 = vmul.f32 %v1385_v24, %v1313_v29  ;;  %v1230_v45 = vadd.f32 %v1229_v38, %v5680_v55  ;;  %v1396_v38 = vld [vmem:[%s6882_s4 + $0xd0] sm:$0xff] }
 0x13e   : > { %v1323_v53 = vmax.f32 %v1119_v41, 0.0  ;;  %v1123_v56 = vadd.f32 %v1122_v49, %v5642_v9  ;;  %1569 = vmatprep.subr.bf16.mxu0 %v1525_v43  ;;  %v1406_v41 = vld [vmem:[%s6882_s4 + $0x120] sm:$0xff]  ;;  %v1522_v43 = vpack.c.bf16 %v1456_v33, %v1452_v22 }
 0x13f   : > { %v1326_v62 = vmax.f32 %v1121_v47, 0.0  ;;  %1570 = vmatpush1.bf16.msra.mxu0 %v1524_v36  ;;  %v1466_v14 = vmul.f32 %v1394_v52, %v1322_v46  ;;  %v1231_v46 = vpop.f32.mrb[9].mxu1  ;;  %v1403_v47 = vld [vmem:[%s6882_s4 + $0x108] sm:$0xff]  ;;  %v1316_v57 = vmax.f32 %v1230_v45, 0.0  ;;  %v1397_v45 = vld [vmem:[%s6882_s4 + $0xd8] sm:$0xff] }
 0x140   : > { %v1327_v10 = vmax.f32 %v1123_v56, 0.0  ;;  %v1467_v19 = vmul.f32 %v1395_v61, %v1323_v53  ;;  %v1232_v52 = vadd.f32 %v1231_v46, %v5685_v59  ;;  %v1233_v53 = vpop.f32.mrb[10].mxu1 }
 0x141   : > { %v1470_v15 = vmul.f32 %v1398_v54, %v1326_v62  ;;  %v1523_v54 = vpack.c.bf16 %v1457_v37, %v1453_v28  ;;  %v1234_v60 = vadd.f32 %v1233_v53, %v5680_v55  ;;  %v1235_v61 = vpop.f32.mrb[11].mxu1  ;;  %v1460_v6 = vmul.f32 %v1388_v51, %v1316_v57  ;;  %v1410_v28 = vld [vmem:[%s6882_s4 + $0x140] sm:$0xff]  ;;  %v1415_v37 = vld [vmem:[%s6882_s4 + $0x168] sm:$0xff] }
 0x142   : > { %v1471_v20 = vmul.f32 %v1399_v63, %v1327_v10  ;;  %v1126_v21 = vpop.f32.mrb[16].mxu0  ;;  %v1317_v0 = vmax.f32 %v1232_v52, 0.0  ;;  %v1236_v2 = vadd.f32 %v1235_v61, %v5685_v59  ;;  %v1400_v52 = vld [vmem:[%s6882_s4 + $0xf0] sm:$0xff]  ;;  %v1401_v61 = vld [vmem:[%s6882_s4 + $0xf8] sm:$0xff] }
 0x143   : > { %v1528_v25 = vpack.c.bf16 %v1470_v15, %v1466_v14  ;;  %v1127_v26 = vadd.f32 %v1126_v21, %v5639_v8  ;;  %v1128_v27 = vpop.f32.mrb[17].mxu0  ;;  %1610 = vmatprep.subr.bf16.mxu1 %v1523_v54  ;;  %v1320_v12 = vmax.f32 %v1234_v60, 0.0 }
 0x144   : > { %v1129_v30 = vadd.f32 %v1128_v27, %v5642_v9  ;;  %v1130_v31 = vpop.f32.mrb[18].mxu0  ;;  %v1529_v32 = vpack.c.bf16 %v1471_v20, %v1467_v19  ;;  %1611 = vmatpush1.bf16.msra.mxu1 %v1522_v43  ;;  %v1461_v17 = vmul.f32 %v1389_v58, %v1317_v0  ;;  %v1321_v18 = vmax.f32 %v1236_v2, 0.0  ;;  %v1239_v27 = vpop.f32.mrb[12].mxu1 }
 0x145   : > { %v1330_v34 = vmax.f32 %v1127_v26, 0.0  ;;  %v1131_v35 = vadd.f32 %v1130_v31, %v5639_v8  ;;  %v1132_v36 = vpop.f32.mrb[19].mxu0  ;;  %v1464_v22 = vmul.f32 %v1392_v1, %v1320_v12  ;;  %v1240_v33 = vadd.f32 %v1239_v27, %v5680_v55  ;;  %v1404_v27 = vld [vmem:[%s6882_s4 + $0x110] sm:$0xff] }
 0x146   : > { %v1331_v40 = vmax.f32 %v1129_v30, 0.0  ;;  %v1133_v42 = vadd.f32 %v1132_v36, %v5642_v9  ;;  %1571 = vmatprep.subr.bf16.mxu0 %v1529_v32  ;;  %v1465_v26 = vmul.f32 %v1393_v13, %v1321_v18  ;;  %v1414_v30 = vld [vmem:[%s6882_s4 + $0x160] sm:$0xff] }
 0x147   : > { %v1334_v49 = vmax.f32 %v1131_v35, 0.0  ;;  %1572 = vmatpush1.bf16.msra.mxu0 %v1528_v25  ;;  %v1474_v62 = vmul.f32 %v1402_v39, %v1330_v34  ;;  %v1526_v32 = vpack.c.bf16 %v1464_v22, %v1460_v6  ;;  %v1241_v34 = vpop.f32.mrb[13].mxu1  ;;  %v1411_v35 = vld [vmem:[%s6882_s4 + $0x148] sm:$0xff]  ;;  %v1324_v43 = vmax.f32 %v1240_v33, 0.0  ;;  %v1405_v33 = vld [vmem:[%s6882_s4 + $0x118] sm:$0xff] }
 0x148   : > { %v1335_v56 = vmax.f32 %v1133_v42, 0.0  ;;  %v1475_v3 = vmul.f32 %v1403_v47, %v1331_v40  ;;  %v1242_v39 = vadd.f32 %v1241_v34, %v5685_v59  ;;  %v1243_v40 = vpop.f32.mrb[14].mxu1 }
 0x149   : > { %v1478_v63 = vmul.f32 %v1406_v41, %v1334_v49  ;;  %v1527_v41 = vpack.c.bf16 %v1465_v26, %v1461_v17  ;;  %v1244_v46 = vadd.f32 %v1243_v40, %v5680_v55  ;;  %v1245_v47 = vpop.f32.mrb[15].mxu1  ;;  %v1468_v58 = vmul.f32 %v1396_v38, %v1324_v43  ;;  %v1418_v17 = vld [vmem:[%s6882_s4 + $0x180] sm:$0xff]  ;;  %v1423_v26 = vld [vmem:[%s6882_s4 + $0x1a8] sm:$0xff] }
 0x14a   : > { %v1479_v10 = vmul.f32 %v1407_v50, %v1335_v56  ;;  %v1136_v11 = vpop.f32.mrb[20].mxu0  ;;  %v1325_v51 = vmax.f32 %v1242_v39, 0.0  ;;  %v1246_v53 = vadd.f32 %v1245_v47, %v5685_v59  ;;  %v1408_v39 = vld [vmem:[%s6882_s4 + $0x130] sm:$0xff]  ;;  %v1409_v47 = vld [vmem:[%s6882_s4 + $0x138] sm:$0xff] }
 0x14b   : > { %v1532_v14 = vpack.c.bf16 %v1478_v63, %v1474_v62  ;;  %v1137_v15 = vadd.f32 %v1136_v11, %v5639_v8  ;;  %v1138_v16 = vpop.f32.mrb[21].mxu0  ;;  %1612 = vmatprep.subr.bf16.mxu1 %v1527_v41  ;;  %v1328_v60 = vmax.f32 %v1244_v46, 0.0 }
 0x14c   : > { %v1139_v19 = vadd.f32 %v1138_v16, %v5642_v9  ;;  %v1140_v20 = vpop.f32.mrb[22].mxu0  ;;  %v1533_v21 = vpack.c.bf16 %v1479_v10, %v1475_v3  ;;  %1613 = vmatpush1.bf16.msra.mxu1 %v1526_v32  ;;  %v1469_v1 = vmul.f32 %v1397_v45, %v1325_v51  ;;  %v1329_v2 = vmax.f32 %v1246_v53, 0.0  ;;  %v1249_v16 = vpop.f32.mrb[16].mxu1 }
 0x14d   : > { %v1338_v23 = vmax.f32 %v1137_v15, 0.0  ;;  %v1141_v24 = vadd.f32 %v1140_v20, %v5639_v8  ;;  %v1142_v25 = vpop.f32.mrb[23].mxu0  ;;  %v1472_v6 = vmul.f32 %v1400_v52, %v1328_v60  ;;  %v1250_v22 = vadd.f32 %v1249_v16, %v5680_v55  ;;  %v1412_v16 = vld [vmem:[%s6882_s4 + $0x150] sm:$0xff] }
 0x14e   : > { %v1339_v29 = vmax.f32 %v1139_v19, 0.0  ;;  %v1143_v31 = vadd.f32 %v1142_v25, %v5642_v9  ;;  %1573 = vmatprep.subr.bf16.mxu0 %v1533_v21  ;;  %v1473_v15 = vmul.f32 %v1401_v61, %v1329_v2  ;;  %v1422_v19 = vld [vmem:[%s6882_s4 + $0x1a0] sm:$0xff] }
 0x14f   : > { %v1342_v36 = vmax.f32 %v1141_v24, 0.0  ;;  %1574 = vmatpush1.bf16.msra.mxu0 %v1532_v14  ;;  %v1482_v49 = vmul.f32 %v1410_v28, %v1338_v23  ;;  %v1530_v21 = vpack.c.bf16 %v1472_v6, %v1468_v58  ;;  %v1251_v23 = vpop.f32.mrb[17].mxu1  ;;  %v1419_v24 = vld [vmem:[%s6882_s4 + $0x188] sm:$0xff]  ;;  %v1332_v32 = vmax.f32 %v1250_v22, 0.0  ;;  %v1413_v22 = vld [vmem:[%s6882_s4 + $0x158] sm:$0xff] }
 0x150   : > { %v1343_v42 = vmax.f32 %v1143_v31, 0.0  ;;  %v1483_v54 = vmul.f32 %v1411_v35, %v1339_v29  ;;  %v1252_v28 = vadd.f32 %v1251_v23, %v5685_v59  ;;  %v1253_v29 = vpop.f32.mrb[18].mxu1 }
 0x151   : > { %v1486_v50 = vmul.f32 %v1414_v30, %v1342_v36  ;;  %v1531_v30 = vpack.c.bf16 %v1473_v15, %v1469_v1  ;;  %v1254_v34 = vadd.f32 %v1253_v29, %v5680_v55  ;;  %v1255_v35 = vpop.f32.mrb[19].mxu1  ;;  %v1476_v45 = vmul.f32 %v1404_v27, %v1332_v32  ;;  %v1426_v1 = vld [vmem:[%s6882_s4 + $0x1c0] sm:$0xff]  ;;  %v1431_v15 = vld [vmem:[%s6882_s4 + $0x1e8] sm:$0xff] }
 0x152   : > { %v1487_v56 = vmul.f32 %v1415_v37, %v1343_v42  ;;  %v1146_v57 = vpop.f32.mrb[24].mxu0  ;;  %v1333_v38 = vmax.f32 %v1252_v28, 0.0  ;;  %v1256_v40 = vadd.f32 %v1255_v35, %v5685_v59  ;;  %v1416_v28 = vld [vmem:[%s6882_s4 + $0x170] sm:$0xff]  ;;  %v1417_v35 = vld [vmem:[%s6882_s4 + $0x178] sm:$0xff] }
 0x153   : > { %v1536_v62 = vpack.c.bf16 %v1486_v50, %v1482_v49  ;;  %v1147_v63 = vadd.f32 %v1146_v57, %v5639_v8  ;;  %v1148_v0 = vpop.f32.mrb[25].mxu0  ;;  %1614 = vmatprep.subr.bf16.mxu1 %v1531_v30  ;;  %v1336_v46 = vmax.f32 %v1254_v34, 0.0 }
 0x154   : > { %v1149_v3 = vadd.f32 %v1148_v0, %v5642_v9  ;;  %v1150_v10 = vpop.f32.mrb[26].mxu0  ;;  %v1537_v11 = vpack.c.bf16 %v1487_v56, %v1483_v54  ;;  %1615 = vmatpush1.bf16.msra.mxu1 %v1530_v21  ;;  %v1477_v52 = vmul.f32 %v1405_v33, %v1333_v38  ;;  %v1337_v53 = vmax.f32 %v1256_v40, 0.0  ;;  %v1259_v0 = vpop.f32.mrb[20].mxu1 }
 0x155   : > { %v1346_v12 = vmax.f32 %v1147_v63, 0.0  ;;  %v1151_v13 = vadd.f32 %v1150_v10, %v5639_v8  ;;  %v1152_v14 = vpop.f32.mrb[27].mxu0  ;;  %v1480_v58 = vmul.f32 %v1408_v39, %v1336_v46  ;;  %v1260_v6 = vadd.f32 %v1259_v0, %v5680_v55 }
 0x156   : > { %v1347_v18 = vmax.f32 %v1149_v3, 0.0  ;;  %v1153_v20 = vadd.f32 %v1152_v14, %v5642_v9  ;;  %1575 = vmatprep.subr.bf16.mxu0 %v1537_v11  ;;  %v1481_v63 = vmul.f32 %v1409_v47, %v1337_v53  ;;  %v1430_v3 = vld [vmem:[%s6882_s4 + $0x1e0] sm:$0xff] }
 0x157   : > { %v1350_v25 = vmax.f32 %v1151_v13, 0.0  ;;  %1576 = vmatpush1.bf16.msra.mxu0 %v1536_v62  ;;  %v1490_v36 = vmul.f32 %v1418_v17, %v1346_v12  ;;  %v1534_v11 = vpack.c.bf16 %v1480_v58, %v1476_v45  ;;  %v1261_v12 = vpop.f32.mrb[21].mxu1  ;;  %v1427_v13 = vld [vmem:[%s6882_s4 + $0x1c8] sm:$0xff]  ;;  %v1340_v21 = vmax.f32 %v1260_v6, 0.0 }
 0x158   : > { %v1351_v31 = vmax.f32 %v1153_v20, 0.0  ;;  %v1491_v41 = vmul.f32 %v1419_v24, %v1347_v18  ;;  %v1262_v17 = vadd.f32 %v1261_v12, %v5685_v59  ;;  %v1263_v18 = vpop.f32.mrb[22].mxu1 }
 0x159   : > { %v1494_v37 = vmul.f32 %v1422_v19, %v1350_v25  ;;  %v1535_v19 = vpack.c.bf16 %v1481_v63, %v1477_v52  ;;  %v1264_v23 = vadd.f32 %v1263_v18, %v5680_v55  ;;  %v1265_v24 = vpop.f32.mrb[23].mxu1  ;;  %v1484_v33 = vmul.f32 %v1412_v16, %v1340_v21  ;;  %v1434_v52 = vld [vmem:[%s6882_s4 + $0x200] sm:$0xff]  ;;  %v1420_v63 = vld [vmem:[%s6882_s4 + $0x190] sm:$0xff]  ;;  %v1425_v21 = vld [vmem:[%s6882_s4 + $0x1b8] sm:$0xff] }
 0x15a   : > { %v1495_v42 = vmul.f32 %v1423_v26, %v1351_v31  ;;  %v1156_v43 = vpop.f32.mrb[28].mxu0  ;;  %v1341_v27 = vmax.f32 %v1262_v17, 0.0  ;;  %v1266_v29 = vadd.f32 %v1265_v24, %v5685_v59 }
 0x15b   : > { %v1540_v49 = vpack.c.bf16 %v1494_v37, %v1490_v36  ;;  %v1157_v50 = vadd.f32 %v1156_v43, %v5639_v8  ;;  %v1158_v51 = vpop.f32.mrb[29].mxu0  ;;  %1616 = vmatprep.subr.bf16.mxu1 %v1535_v19  ;;  %v1344_v34 = vmax.f32 %v1264_v23, 0.0 }
 0x15c   : > { %v1159_v54 = vadd.f32 %v1158_v51, %v5642_v9  ;;  %v1160_v56 = vpop.f32.mrb[30].mxu0  ;;  %v1541_v57 = vpack.c.bf16 %v1495_v42, %v1491_v41  ;;  %1617 = vmatpush1.bf16.msra.mxu1 %v1534_v11  ;;  %v1485_v39 = vmul.f32 %v1413_v22, %v1341_v27  ;;  %v1345_v40 = vmax.f32 %v1266_v29, 0.0  ;;  %v1269_v51 = vpop.f32.mrb[24].mxu1  ;;  %v4881_v27 = vld [vmem:[%s6884_s6 + $0x4] ss:$20 sps:$4 sm:$0xff]  }
 0x15d   : > { %v1354_v60 = vmax.f32 %v1157_v50, 0.0  ;;  %v1161_v61 = vadd.f32 %v1160_v56, %v5639_v8  ;;  %v1162_v62 = vpop.f32.mrb[31].mxu0  ;;  %v1488_v45 = vmul.f32 %v1416_v28, %v1344_v34  ;;  %v1270_v58 = vadd.f32 %v1269_v51, %v5680_v55  ;;  %v1428_v34 = vld [vmem:[%s6882_s4 + $0x1d0] sm:$0xff]  ;;  %v1433_v51 = vld [vmem:[%s6882_s4 + $0x1f8] sm:$0xff] }
 0x15e   : > { %v1355_v2 = vmax.f32 %v1159_v54, 0.0  ;;  %v1163_v10 = vadd.f32 %v1162_v62, %v5642_v9  ;;  %1577 = vmatprep.subr.bf16.mxu0 %v1541_v57  ;;  %v1489_v50 = vmul.f32 %v1417_v35, %v1345_v40  ;;  %v1438_v54 = vld [vmem:[%s6882_s4 + $0x220] sm:$0xff]  ;;  %v1439_v62 = vld [vmem:[%s6882_s4 + $0x228] sm:$0xff]  ;;  %v1429_v40 = vld [vmem:[%s6882_s4 + $0x1d8] sm:$0xff] }
 0x15f   : > { %v1358_v14 = vmax.f32 %v1161_v61, 0.0  ;;  %1578 = vmatpush1.bf16.msra.mxu0 %v1540_v49  ;;  %v1498_v25 = vmul.f32 %v1426_v1, %v1354_v60  ;;  %v1538_v57 = vpack.c.bf16 %v1488_v45, %v1484_v33  ;;  %v1271_v60 = vpop.f32.mrb[25].mxu1 }
 0x160   : > { %v1359_v20 = vmax.f32 %v1163_v10, 0.0  ;;  %v1499_v30 = vmul.f32 %v1427_v13, %v1355_v2  ;;  %v1273_v0 = vpop.f32.mrb[26].mxu1  ;;  %v1539_v1 = vpack.c.bf16 %v1489_v50, %v1485_v39  ;;  %v1421_v10 = vld [vmem:[%s6882_s4 + $0x198] sm:$0xff] }
 0x161   : > { %v1502_v26 = vmul.f32 %v1430_v3, %v1358_v14  ;;  %v1348_v3 = vmax.f32 %v1270_v58, 0.0  ;;  %v1274_v11 = vadd.f32 %v1273_v0, %v5680_v55  ;;  %v1275_v6 = vpop.f32.mrb[27].mxu1 }
 0x162   : > { %v1503_v31 = vmul.f32 %v1431_v15, %v1359_v20  ;;  %v1166_v32 = vpop.f32.mrb[32].mxu0  ;;  %v1424_v15 = vld [vmem:[%s6882_s4 + $0x1b0] sm:$0xff]  ;;  %v1276_v16 = vadd.f32 %v1275_v6, %v5685_v59  ;;  %1618 = vmatprep.subr.bf16.mxu1 %v1539_v1  ;;  %v1279_v29 = vpop.f32.mrb[28].mxu1 }
 0x163   : > { %v1544_v36 = vpack.c.bf16 %v1502_v26, %v1498_v25  ;;  %v1167_v37 = vadd.f32 %v1166_v32, %v5639_v8  ;;  %v1168_v38 = vpop.f32.mrb[33].mxu0  ;;  %v1492_v19 = vmul.f32 %v1420_v63, %v1348_v3  ;;  %v1352_v20 = vmax.f32 %v1274_v11, 0.0  ;;  %1619 = vmatpush1.bf16.msra.mxu1 %v1538_v57  ;;  %v1281_v33 = vpop.f32.mrb[29].mxu1  ;;  %v4893_v57 = vld [vmem:[%s6884_s6 + $0x54] ss:$20 sps:$4 sm:$0xff]  }
 0x164   : > { %v1169_v41 = vadd.f32 %v1168_v38, %v5642_v9  ;;  %v1170_v42 = vpop.f32.mrb[34].mxu0  ;;  %v1545_v43 = vpack.c.bf16 %v1503_v31, %v1499_v30  ;;  %v1353_v24 = vmax.f32 %v1276_v16, 0.0  ;;  %v5916_v30 = vld [vmem:[%s6883_s5] ss:$8 sps:$4 sm:$0x1f]   ;;  %v1280_v32 = vadd.f32 %v1279_v29, %v5680_v55  ;;  %v1436_v63 = vld [vmem:[%s6882_s4 + $0x210] sm:$0xff] }
 0x165   : > { %v1362_v46 = vmax.f32 %v1167_v37, 0.0  ;;  %v1171_v47 = vadd.f32 %v1170_v42, %v5639_v8  ;;  %v1172_v49 = vpop.f32.mrb[35].mxu0  ;;  %v1435_v8 = vld [vmem:[%s6882_s4 + $0x208] sm:$0xff]  ;;  %v1496_v26 = vmul.f32 %v1424_v15, %v1352_v20  ;;  %v1282_v35 = vadd.f32 %v1281_v33, %v5685_v59  ;;  %v4879_v38 = vld [vmem:[%s6884_s6] ss:$20 sps:$4 sm:$0xff]  }
 0x166   : > { %v1363_v53 = vmax.f32 %v1169_v41, 0.0  ;;  %v1173_v56 = vadd.f32 %v1172_v49, %v5642_v9  ;;  %1579 = vmatprep.subr.bf16.mxu0 %v1545_v43  ;;  %v1272_v9 = vadd.f32 %v1271_v60, %v5685_v59  ;;  %v1497_v28 = vmul.f32 %v1425_v21, %v1353_v24  ;;  %v4887_v43 = vld [vmem:[%s6884_s6 + $0x2c] ss:$20 sps:$4 sm:$0xff]   ;;  %v4890_v29 = vld [vmem:[%s6884_s6 + $0x34] ss:$20 sps:$4 sm:$0xff]  }
 0x167   : > { %v1366_v61 = vmax.f32 %v1171_v47, 0.0  ;;  %1580 = vmatpush1.bf16.msra.mxu0 %v1544_v36  ;;  %v1506_v12 = vmul.f32 %v1434_v52, %v1362_v46  ;;  %v1542_v31 = vpack.c.bf16 %v1496_v26, %v1492_v19  ;;  %v1283_v36 = vpop.f32.mrb[30].mxu1  ;;  %v1356_v39 = vmax.f32 %v1280_v32, 0.0  ;;  %v1432_v46 = vld [vmem:[%s6882_s4 + $0x1f0] sm:$0xff]  ;;  %v4897_v20 = vld [vmem:[%s6884_s6 + $0x78] ss:$20 sps:$4 sm:$0xff]  }
 0x168   : > { %v1367_v2 = vmax.f32 %v1173_v56, 0.0  ;;  %v1349_v14 = vmax.f32 %v1272_v9, 0.0  ;;  %v1507_v17 = vmul.f32 %v1435_v8, %v1363_v53  ;;  %v1284_v41 = vadd.f32 %v1283_v36, %v5680_v55  ;;  %v1285_v42 = vpop.f32.mrb[31].mxu1  ;;  %v4903_v26 = vld [vmem:[%s6884_s6 + $0xa0] ss:$20 sps:$4 sm:$0xff]  }
 0x169   : > { %v1510_v13 = vmul.f32 %v1438_v54, %v1366_v61  ;;  %v1357_v45 = vmax.f32 %v1282_v35, 0.0  ;;  %v1286_v47 = vadd.f32 %v1285_v42, %v5685_v59  ;;  %v1500_v49 = vmul.f32 %v1428_v34, %v1356_v39  ;;  %v4885_v54 = vld [vmem:[%s6884_s6 + $0x28] ss:$20 sps:$4 sm:$0xff]   ;;  %v1289_v60 = vpop.f32.mrb[32].mxu1  ;;  %v4888_v33 = vld [vmem:[%s6884_s6 + $0x30] ss:$20 sps:$4 sm:$0xff]  }
 0x16a   : > { %v1511_v18 = vmul.f32 %v1439_v62, %v1367_v2  ;;  %v1493_v23 = vmul.f32 %v1421_v10, %v1349_v14  ;;  %v1360_v50 = vmax.f32 %v1284_v41, 0.0  ;;  %v1290_v61 = vadd.f32 %v1289_v60, %v5680_v55  ;;  %v1291_v62 = vpop.f32.mrb[33].mxu1  ;;  %v4891_v2 = vld [vmem:[%s6884_s6 + $0x50] ss:$20 sps:$4 sm:$0xff]   ;;  %v1437_v10 = vld [vmem:[%s6882_s4 + $0x218] sm:$0xff] }
 0x16b   : > { %v1548_v22 = vpack.c.bf16 %v1510_v13, %v1506_v12  ;;  %v1501_v52 = vmul.f32 %v1429_v40, %v1357_v45  ;;  %v1361_v53 = vmax.f32 %v1286_v47, 0.0  ;;  %v1292_v9 = vadd.f32 %v1291_v62, %v5685_v59  ;;  %v1293_v0 = vpop.f32.mrb[34].mxu1  ;;  %v4899_v12 = vld [vmem:[%s6884_s6 + $0x7c] ss:$20 sps:$4 sm:$0xff]   ;;  %v4917_v32 = vld [vmem:[%s6884_s6 + $0xf4] ss:$20 sps:$4 sm:$0xff]  }
 0x16c   : > { %v1549_v25 = vpack.c.bf16 %v1511_v18, %v1507_v17  ;;  %v1543_v37 = vpack.c.bf16 %v1497_v28, %v1493_v23  ;;  %v1504_v56 = vmul.f32 %v1432_v46, %v1360_v50  ;;  %v1364_v3 = vmax.f32 %v1290_v61, 0.0  ;;  %v1295_v6 = vpop.f32.mrb[35].mxu1  ;;  %v1440_v14 = vld [vmem:[%s6882_s4 + $0x230] sm:$0xff]  ;;  %v4882_v28 = vld [vmem:[%s6884_s6 + $0x8] ss:$20 sps:$4 sm:$0xff]  }
 0x16d   : > { %v1505_v58 = vmul.f32 %v1433_v51, %v1361_v53  ;;  %v1294_v11 = vadd.f32 %v1293_v0, %v5680_v55  ;;  %v1365_v13 = vmax.f32 %v1292_v9, 0.0  ;;  %v1296_v15 = vadd.f32 %v1295_v6, %v5685_v59  ;;  %v1441_v55 = vld [vmem:[%s6882_s4 + $0x238] sm:$0xff]  ;;  %v4915_v35 = vld [vmem:[%s6884_s6 + $0xf0] ss:$20 sps:$4 sm:$0xff]   ;;  %v4900_v40 = vld [vmem:[%s6884_s6 + $0x80] ss:$20 sps:$4 sm:$0xff]  }
 0x16e   : > { %1581 = vmatprep.subr.bf16.mxu0 %v1549_v25  ;;  %1620 = vmatprep.subr.bf16.mxu1 %v1543_v37  ;;  %v1546_v8 = vpack.c.bf16 %v1504_v56, %v1500_v49  ;;  %v1508_v16 = vmul.f32 %v1436_v63, %v1364_v3  ;;  %v4905_v59 = vld [vmem:[%s6884_s6 + $0xa4] ss:$20 sps:$4 sm:$0xff]   ;;  %v4884_v25 = vld [vmem:[%s6884_s6 + $0xc] ss:$20 sps:$4 sm:$0xff]   ;;  %v4896_v34 = vld [vmem:[%s6884_s6 + $0x5c] ss:$20 sps:$4 sm:$0xff]  }
 0x16f   : > { %1582 = vmatpush1.bf16.msra.mxu0 %v1548_v22  ;;  %1621 = vmatpush1.bf16.msra.mxu1 %v1542_v31  ;;  %v1547_v1 = vpack.c.bf16 %v1505_v58, %v1501_v52  ;;  %v1368_v17 = vmax.f32 %v1294_v11, 0.0  ;;  %v1509_v18 = vmul.f32 %v1437_v10, %v1365_v13  ;;  %v1369_v19 = vmax.f32 %v1296_v15, 0.0  ;;  %v4909_v31 = vld [vmem:[%s6884_s6 + $0xc8] ss:$20 sps:$4 sm:$0xff]   ;;  %v4894_v36 = vld [vmem:[%s6884_s6 + $0x58] ss:$20 sps:$4 sm:$0xff]  }
 0x170   : > { %2706 = vmatprep.subr.bf16.mxu0 %v4881_v27  ;;  %v4911_v27 = vld [vmem:[%s6884_s6 + $0xcc] ss:$20 sps:$4 sm:$0xff]   ;;  %v4902_v37 = vld [vmem:[%s6884_s6 + $0x84] ss:$20 sps:$4 sm:$0xff]   ;;  %v4906_v45 = vld [vmem:[%s6884_s6 + $0xa8] ss:$20 sps:$4 sm:$0xff]  }
 0x171   : > { %1622 = vmatprep.subr.bf16.mxu1 %v1547_v1  ;;  %v1512_v21 = vmul.f32 %v1440_v14, %v1368_v17  ;;  %v1513_v22 = vmul.f32 %v1441_v55, %v1369_v19  ;;  %v4929_v39 = vld [vmem:[%s6884_s6 + $0x144] ss:$20 sps:$4 sm:$0xff]   ;;  %v4908_v41 = vld [vmem:[%s6884_s6 + $0xac] ss:$20 sps:$4 sm:$0xff]   ;;  %v4914_v46 = vld [vmem:[%s6884_s6 + $0xd4] ss:$20 sps:$4 sm:$0xff]  }
 0x172   : > { %1598 = vmatmul.mubr.bf16.vlgmr.msra.gmra.mrb[36].mxu0 %v5916_v30  ;;  %v4927_v42 = vld [vmem:[%s6884_s6 + $0x140] ss:$20 sps:$4 sm:$0xff]   ;;  %v4933_v47 = vld [vmem:[%s6884_s6 + $0x168] ss:$20 sps:$4 sm:$0xff]   ;;  %v4912_v50 = vld [vmem:[%s6884_s6 + $0xd0] ss:$20 sps:$4 sm:$0xff]  }
 0x173   : > { %2707 = vmatpush1.bf16.msra.mxu0 %v4879_v38  ;;  %1623 = vmatpush1.bf16.msra.mxu1 %v1546_v8  ;;  %v1550_v23 = vpack.c.bf16 %v1512_v21, %v1508_v16  ;;  %v1551_v24 = vpack.c.bf16 %v1513_v22, %v1509_v18  ;;  %v4921_v38 = vld [vmem:[%s6884_s6 + $0x118] ss:$20 sps:$4 sm:$0xff]   ;;  %v4941_v49 = vld [vmem:[%s6884_s6 + $0x194] ss:$20 sps:$4 sm:$0xff]   ;;  %v4920_v51 = vld [vmem:[%s6884_s6 + $0xfc] ss:$20 sps:$4 sm:$0xff]  }
 0x174   : > { %2708 = vmatprep.subr.bf16.mxu0 %v4887_v43  ;;  %v4935_v43 = vld [vmem:[%s6884_s6 + $0x16c] ss:$20 sps:$4 sm:$0xff]   ;;  %v4939_v52 = vld [vmem:[%s6884_s6 + $0x190] ss:$20 sps:$4 sm:$0xff]   ;;  %v4930_v63 = vld [vmem:[%s6884_s6 + $0x148] ss:$20 sps:$4 sm:$0xff]  }
 0x175   : > { %1624 = vmatprep.subr.bf16.mxu1 %v1551_v24  ;;  %v4947_v53 = vld [vmem:[%s6884_s6 + $0x1bc] ss:$20 sps:$4 sm:$0xff]   ;;  %v4926_v56 = vld [vmem:[%s6884_s6 + $0x124] ss:$20 sps:$4 sm:$0xff]   ;;  %v4924_v60 = vld [vmem:[%s6884_s6 + $0x120] ss:$20 sps:$4 sm:$0xff]  }
 0x176   : > { %v4953_v58 = vld [vmem:[%s6884_s6 + $0x1e4] ss:$20 sps:$4 sm:$0xff]   ;;  %v4932_v8 = vld [vmem:[%s6884_s6 + $0x14c] ss:$20 sps:$4 sm:$0xff]   ;;  %v4938_v9 = vld [vmem:[%s6884_s6 + $0x174] ss:$20 sps:$4 sm:$0xff]  }
 0x177   : > { %2709 = vmatpush1.bf16.msra.mxu0 %v4885_v54  ;;  %1625 = vmatpush1.bf16.msra.mxu1 %v1550_v23  ;;  %v4918_v54 = vld [vmem:[%s6884_s6 + $0xf8] ss:$20 sps:$4 sm:$0xff]   ;;  %v4951_v61 = vld [vmem:[%s6884_s6 + $0x1e0] ss:$20 sps:$4 sm:$0xff]   ;;  %v4957_v0 = vld [vmem:[%s6884_s6 + $0x208] ss:$20 sps:$4 sm:$0xff]  }
 0x178   : > { %2710 = vmatprep.subr.bf16.mxu0 %v4893_v57  ;;  %2792 = vmatprep.subr.bf16.mxu1 %v4884_v25  ;;  %v4945_v57 = vld [vmem:[%s6884_s6 + $0x1b8] ss:$20 sps:$4 sm:$0xff]   ;;  %v4965_v1 = vld [vmem:[%s6884_s6 + $0x234] ss:$20 sps:$4 sm:$0xff]   ;;  %v4944_v3 = vld [vmem:[%s6884_s6 + $0x19c] ss:$20 sps:$4 sm:$0xff]  }
 0x179   : > { %v4959_v62 = vld [vmem:[%s6884_s6 + $0x20c] ss:$20 sps:$4 sm:$0xff]   ;;  %v4963_v10 = vld [vmem:[%s6884_s6 + $0x230] ss:$20 sps:$4 sm:$0xff]   ;;  %v4954_v14 = vld [vmem:[%s6884_s6 + $0x1e8] ss:$20 sps:$4 sm:$0xff]  }
 0x17a   : > { %1641 = vmatmul.mubr.bf16.vlgmr.msra.gmra.mrb[36].mxu1 %v5916_v30  ;;  %v4923_v30 = vld [vmem:[%s6884_s6 + $0x11c] ss:$20 sps:$4 sm:$0xff]   ;;  %v4942_v11 = vld [vmem:[%s6884_s6 + $0x198] ss:$20 sps:$4 sm:$0xff]   ;;  %v4962_v15 = vld [vmem:[%s6884_s6 + $0x214] ss:$20 sps:$4 sm:$0xff]  }
 0x17b   : > { %2711 = vmatpush1.bf16.msra.mxu0 %v4891_v2  ;;  %2793 = vmatpush1.bf16.msra.mxu1 %v4882_v28  ;;  %v4936_v2 = vld [vmem:[%s6884_s6 + $0x170] ss:$20 sps:$4 sm:$0xff]   ;;  %v4956_v13 = vld [vmem:[%s6884_s6 + $0x1ec] ss:$20 sps:$4 sm:$0xff]  }
 0x17c   : > { %2712 = vmatprep.subr.bf16.mxu0 %v4899_v12  ;;  %2794 = vmatprep.subr.bf16.mxu1 %v4890_v29  ;;  %v4950_v6 = vld [vmem:[%s6884_s6 + $0x1c4] ss:$20 sps:$4 sm:$0xff]   ;;  %v4948_v12 = vld [vmem:[%s6884_s6 + $0x1c0] ss:$20 sps:$4 sm:$0xff]   ;;  %v4968_v17 = vld [vmem:[%s6884_s6 + $0x23c] ss:$20 sps:$4 sm:$0xff]  }
 0x17d   : > { %v4960_v16 = vld [vmem:[%s6884_s6 + $0x210] ss:$20 sps:$4 sm:$0xff]   ;;  %v4966_v55 = vld [vmem:[%s6884_s6 + $0x238] ss:$20 sps:$4 sm:$0xff]   ;;  %v4972_v21 = vld [vmem:[%s6884_s6 + $0x260] ss:$20 sps:$4 sm:$0xff]  }
 0x17e   : > { %v4971_v18 = vld [vmem:[%s6884_s6 + $0x25c] ss:$20 sps:$4 sm:$0xff]   ;;  %v4974_v19 = vld [vmem:[%s6884_s6 + $0x264] ss:$20 sps:$4 sm:$0xff]   ;;  %v4980_v22 = vld [vmem:[%s6884_s6 + $0x28c] ss:$20 sps:$4 sm:$0xff]  }
 0x17f   : > { %2713 = vmatpush1.bf16.msra.mxu0 %v4897_v20  ;;  %2795 = vmatpush1.bf16.msra.mxu1 %v4888_v33  ;;  %v4969_v20 = vld [vmem:[%s6884_s6 + $0x258] ss:$20 sps:$4 sm:$0xff]   ;;  %v4975_v29 = vld [vmem:[%s6884_s6 + $0x280] ss:$20 sps:$4 sm:$0xff]  }
 0x180   : > { %2714 = vmatprep.subr.bf16.mxu0 %v4905_v59  ;;  %2796 = vmatprep.subr.bf16.mxu1 %v4896_v34  ;;  %v4977_v59 = vld [vmem:[%s6884_s6 + $0x284] ss:$20 sps:$4 sm:$0xff]   ;;  %v4986_v33 = vld [vmem:[%s6884_s6 + $0x2b4] ss:$20 sps:$4 sm:$0xff]  }
 0x181   : > { %v4981_v34 = vld [vmem:[%s6884_s6 + $0x2a8] ss:$20 sps:$4 sm:$0xff]  }
 0x183   : > { %2715 = vmatpush1.bf16.msra.mxu0 %v4903_v26  ;;  %2797 = vmatpush1.bf16.msra.mxu1 %v4894_v36  ;;  %v4992_v36 = vld [vmem:[%s6884_s6 + $0x2dc] ss:$20 sps:$4 sm:$0xff]  }
 0x184   : > { %2716 = vmatprep.subr.bf16.mxu0 %v4911_v27  ;;  %2798 = vmatprep.subr.bf16.mxu1 %v4902_v37  ;;  %v4987_v37 = vld [vmem:[%s6884_s6 + $0x2d0] ss:$20 sps:$4 sm:$0xff]  }
 0x187   : > { %2717 = vmatpush1.bf16.msra.mxu0 %v4909_v31  ;;  %2799 = vmatpush1.bf16.msra.mxu1 %v4900_v40  ;;  %v4978_v31 = vld [vmem:[%s6884_s6 + $0x288] ss:$20 sps:$4 sm:$0xff]   ;;  %v4998_v40 = vld [vmem:[%s6884_s6 + $0x304] ss:$20 sps:$4 sm:$0xff]  }
 0x188   : > { %2718 = vmatprep.subr.bf16.mxu0 %v4917_v32  ;;  %2800 = vmatprep.subr.bf16.mxu1 %v4908_v41  ;;  %v4983_v32 = vld [vmem:[%s6884_s6 + $0x2ac] ss:$20 sps:$4 sm:$0xff]  }
 0x189   : > { %v4993_v41 = vld [vmem:[%s6884_s6 + $0x2f8] ss:$20 sps:$4 sm:$0xff]  }
 0x18b   : > { %2719 = vmatpush1.bf16.msra.mxu0 %v4915_v35  ;;  %2801 = vmatpush1.bf16.msra.mxu1 %v4906_v45  ;;  %v4984_v35 = vld [vmem:[%s6884_s6 + $0x2b0] ss:$20 sps:$4 sm:$0xff]   ;;  %v5004_v45 = vld [vmem:[%s6884_s6 + $0x32c] ss:$20 sps:$4 sm:$0xff]  }
 0x18c   : > { %2720 = vmatprep.subr.bf16.mxu0 %v4923_v30  ;;  %2802 = vmatprep.subr.bf16.mxu1 %v4914_v46  ;;  %v4989_v30 = vld [vmem:[%s6884_s6 + $0x2d4] ss:$20 sps:$4 sm:$0xff]  }
 0x18f   : > { %2721 = vmatpush1.bf16.msra.mxu0 %v4921_v38  ;;  %2803 = vmatpush1.bf16.msra.mxu1 %v4912_v50  ;;  %v4990_v38 = vld [vmem:[%s6884_s6 + $0x2d8] ss:$20 sps:$4 sm:$0xff]  }
 0x190   : > { %2722 = vmatprep.subr.bf16.mxu0 %v4929_v39  ;;  %2804 = vmatprep.subr.bf16.mxu1 %v4920_v51  ;;  %v4995_v39 = vld [vmem:[%s6884_s6 + $0x2fc] ss:$20 sps:$4 sm:$0xff]   ;;  %v5007_v51 = vld [vmem:[%s6884_s6 + $0x34c] ss:$20 sps:$4 sm:$0xff]  }
 0x193   : > { %2723 = vmatpush1.bf16.msra.mxu0 %v4927_v42  ;;  %2805 = vmatpush1.bf16.msra.mxu1 %v4918_v54  ;;  %v4996_v42 = vld [vmem:[%s6884_s6 + $0x300] ss:$20 sps:$4 sm:$0xff]  }
 0x194   : > { %2724 = vmatprep.subr.bf16.mxu0 %v4935_v43  ;;  %2806 = vmatprep.subr.bf16.mxu1 %v4926_v56  ;;  %v5001_v43 = vld [vmem:[%s6884_s6 + $0x324] ss:$20 sps:$4 sm:$0xff]  }
 0x197   : > { %2725 = vmatpush1.bf16.msra.mxu0 %v4933_v47  ;;  %2807 = vmatpush1.bf16.msra.mxu1 %v4924_v60  ;;  %v4999_v47 = vld [vmem:[%s6884_s6 + $0x320] ss:$20 sps:$4 sm:$0xff]   ;;  %v5008_v60 = vld [vmem:[%s6884_s6 + $0x350] ss:$20 sps:$4 sm:$0xff]  }
 0x198   : > { %2726 = vmatprep.subr.bf16.mxu0 %v4941_v49  ;;  %2808 = vmatprep.subr.bf16.mxu1 %v4932_v8  ;;  %v5002_v49 = vld [vmem:[%s6884_s6 + $0x328] ss:$20 sps:$4 sm:$0xff]  }
 0x199   : > { %v5013_v8 = vld [vmem:[%s6884_s6 + $0x374] ss:$20 sps:$4 sm:$0xff]  }
 0x19b   : > { %2727 = vmatpush1.bf16.msra.mxu0 %v4939_v52  ;;  %2809 = vmatpush1.bf16.msra.mxu1 %v4930_v63  ;;  %v5010_v52 = vld [vmem:[%s6884_s6 + $0x354] ss:$20 sps:$4 sm:$0xff]   ;;  %v5014_v63 = vld [vmem:[%s6884_s6 + $0x378] ss:$20 sps:$4 sm:$0xff]  }
 0x19c   : > { %2728 = vmatprep.subr.bf16.mxu0 %v4947_v53  ;;  %2810 = vmatprep.subr.bf16.mxu1 %v4938_v9  ;;  %v5019_v9 = vld [vmem:[%s6884_s6 + $0x39c] ss:$20 sps:$4 sm:$0xff]  }
 0x19f   : > { %2729 = vmatpush1.bf16.msra.mxu0 %v4945_v57  ;;  %2811 = vmatpush1.bf16.msra.mxu1 %v4936_v2  ;;  %v5020_v2 = vld [vmem:[%s6884_s6 + $0x3a0] ss:$20 sps:$4 sm:$0xff]  }
 0x1a0   : > { %2730 = vmatprep.subr.bf16.mxu0 %v4953_v58  ;;  %2812 = vmatprep.subr.bf16.mxu1 %v4944_v3  ;;  %v5005_v58 = vld [vmem:[%s6884_s6 + $0x348] ss:$20 sps:$4 sm:$0xff]   ;;  %v5025_v3 = vld [vmem:[%s6884_s6 + $0x3c4] ss:$20 sps:$4 sm:$0xff]  }
 0x1a3   : > { %2731 = vmatpush1.bf16.msra.mxu0 %v4951_v61  ;;  %2813 = vmatpush1.bf16.msra.mxu1 %v4942_v11  ;;  %v5016_v61 = vld [vmem:[%s6884_s6 + $0x37c] ss:$20 sps:$4 sm:$0xff]   ;;  %v5023_v11 = vld [vmem:[%s6884_s6 + $0x3c0] ss:$20 sps:$4 sm:$0xff]  }
 0x1a4   : > { %2732 = vmatprep.subr.bf16.mxu0 %v4959_v62  ;;  %2814 = vmatprep.subr.bf16.mxu1 %v4950_v6  ;;  %v5011_v62 = vld [vmem:[%s6884_s6 + $0x370] ss:$20 sps:$4 sm:$0xff]   ;;  %v5026_v6 = vld [vmem:[%s6884_s6 + $0x3c8] ss:$20 sps:$4 sm:$0xff]  }
 0x1a7   : > { %2733 = vmatpush1.bf16.msra.mxu0 %v4957_v0  ;;  %2815 = vmatpush1.bf16.msra.mxu1 %v4948_v12  ;;  %v5022_v0 = vld [vmem:[%s6884_s6 + $0x3a4] ss:$20 sps:$4 sm:$0xff]   ;;  %v5031_v12 = vld [vmem:[%s6884_s6 + $0x3ec] ss:$20 sps:$4 sm:$0xff]  }
 0x1a8   : > { %2734 = vmatprep.subr.bf16.mxu0 %v4965_v1  ;;  %2816 = vmatprep.subr.bf16.mxu1 %v4956_v13  ;;  %v5017_v1 = vld [vmem:[%s6884_s6 + $0x398] ss:$20 sps:$4 sm:$0xff]   ;;  %v5034_v13 = vld [vmem:[%s6884_s6 + $0x3f4] ss:$20 sps:$4 sm:$0xff]  }
 0x1ab   : > { %2735 = vmatpush1.bf16.msra.mxu0 %v4963_v10  ;;  %2817 = vmatpush1.bf16.msra.mxu1 %v4954_v14  ;;  %v5028_v10 = vld [vmem:[%s6884_s6 + $0x3cc] ss:$20 sps:$4 sm:$0xff]   ;;  %v5029_v14 = vld [vmem:[%s6884_s6 + $0x3e8] ss:$20 sps:$4 sm:$0xff]  }
 0x1ac   : > { %2818 = vmatprep.subr.bf16.mxu1 %v4962_v15  ;;  %2736 = vmatprep.subr.bf16.mxu0 %v4971_v18  ;;  %v5032_v15 = vld [vmem:[%s6884_s6 + $0x3f0] ss:$20 sps:$4 sm:$0xff]   ;;  %v5038_v18 = vld [vmem:[%s6884_s6 + $0x418] ss:$20 sps:$4 sm:$0xff]  }
 0x1af   : > { %2819 = vmatpush1.bf16.msra.mxu1 %v4960_v16  ;;  %2737 = vmatpush1.bf16.msra.mxu0 %v4969_v20  ;;  %v5037_v16 = vld [vmem:[%s6884_s6 + $0x414] ss:$20 sps:$4 sm:$0xff]   ;;  %v5046_v20 = vld [vmem:[%s6884_s6 + $0x444] ss:$20 sps:$4 sm:$0xff]  }
 0x1b0   : > { %2820 = vmatprep.subr.bf16.mxu1 %v4968_v17  ;;  %2749 = vmatprep.subr.bf16.mxu0 %v4977_v59  ;;  %v5040_v17 = vld [vmem:[%s6884_s6 + $0x41c] ss:$20 sps:$4 sm:$0xff]   ;;  %v5044_v59 = vld [vmem:[%s6884_s6 + $0x440] ss:$20 sps:$4 sm:$0xff]  }
 0x1b3   : > { %2821 = vmatpush1.bf16.msra.mxu1 %v4966_v55  ;;  %v5035_v55 = vld [vmem:[%s6884_s6 + $0x410] ss:$20 sps:$4 sm:$0xff]  }
 0x1b4   : > { %2822 = vmatprep.subr.bf16.mxu1 %v4974_v19  ;;  %v5043_v19 = vld [vmem:[%s6884_s6 + $0x43c] ss:$20 sps:$4 sm:$0xff]  }
 0x1b7   : > { %2823 = vmatpush1.bf16.msra.mxu1 %v4972_v21  ;;  %v5041_v21 = vld [vmem:[%s6884_s6 + $0x438] ss:$20 sps:$4 sm:$0xff]  }
 0x1b8   : > { %2835 = vmatprep.subr.bf16.mxu1 %v4980_v22  ;;  %v5049_v22 = vld [vmem:[%s6884_s6 + $0x464] ss:$20 sps:$4 sm:$0xff]  }
 0x245   : > { %v1599_v23 = vpop.f32.mrb[36].mxu0 }
 0x246   : > { %v1601_v24 = vpop.f32.mrb[37].mxu0 }
 0x247   : > { %v1603_v25 = vpop.f32.mrb[38].mxu0 }
 0x248   : > { %v6147_v26 = vpack.c.bf16 %v1603_v25, %v1599_v23  ;;  %v1605_v27 = vpop.f32.mrb[39].mxu0  ;;  %v5052_v23 = vld [vmem:[%s6884_s6 + $0x46c] ss:$20 sps:$4 sm:$0xff]   ;;  %v5050_v25 = vld [vmem:[%s6884_s6 + $0x468] ss:$20 sps:$4 sm:$0xff]  }
 0x249   : > { %v6149_v28 = vpack.c.bf16 %v1605_v27, %v1601_v24  ;;  %v5047_v24 = vld [vmem:[%s6884_s6 + $0x460] ss:$20 sps:$4 sm:$0xff]  }
 0x24a   : > { %v5055_v27 = vld [vmem:[%s6884_s6 + $0x48c] ss:$20 sps:$4 sm:$0xff]  }
 0x24b   : > { %2738 = vmatprep.mubr.bf16.mxu0 %v6149_v28  ;;  %2824 = vmatprep.mubr.bf16.mxu1 %v6149_v28 }
 0x24c   : > { %2739 = vmatmul.mubr.bf16.vlgmr.msra.gmra.mrb[40].mxu0 %v6147_v26  ;;  %2825 = vmatmul.mubr.bf16.vlgmr.msra.gmra.mrb[40].mxu1 %v6147_v26 }
 0x24d   : > { %2750 = vmatpush1.bf16.msra.mxu0 %v4975_v29  ;;  %2836 = vmatpush1.bf16.msra.mxu1 %v4978_v31  ;;  %v1642_v46 = vpop.f32.mrb[36].mxu1  ;;  %v5058_v29 = vld [vmem:[%s6884_s6 + $0x494] ss:$20 sps:$4 sm:$0xff]  }
 0x24e   : > { %2751 = vmatprep.subr.bf16.mxu0 %v4983_v32  ;;  %2837 = vmatprep.subr.bf16.mxu1 %v4986_v33  ;;  %v1644_v50 = vpop.f32.mrb[37].mxu1  ;;  %v5053_v31 = vld [vmem:[%s6884_s6 + $0x488] ss:$20 sps:$4 sm:$0xff]   ;;  %v5056_v32 = vld [vmem:[%s6884_s6 + $0x490] ss:$20 sps:$4 sm:$0xff]  }
 0x24f   : > { %v1646_v53 = vpop.f32.mrb[38].mxu1  ;;  %v5061_v33 = vld [vmem:[%s6884_s6 + $0x4b4] ss:$20 sps:$4 sm:$0xff]  }
 0x250   : > { %v6215_v54 = vpack.c.bf16 %v1646_v53, %v1642_v46  ;;  %v1648_v56 = vpop.f32.mrb[39].mxu1  ;;  %v5076_v46 = vld [vmem:[%s6884_s6 + $0x3f8] ss:$20 sps:$4 sm:$0xff]   ;;  %v5083_v53 = vld [vmem:[%s6884_s6 + $0x1c8] ss:$20 sps:$4 sm:$0xff]  }
 0x251   : > { %2752 = vmatpush1.bf16.msra.mxu0 %v4981_v34  ;;  %2838 = vmatpush1.bf16.msra.mxu1 %v4984_v35  ;;  %v6217_v57 = vpack.c.bf16 %v1648_v56, %v1644_v50  ;;  %v5064_v34 = vld [vmem:[%s6884_s6 + $0x4bc] ss:$20 sps:$4 sm:$0xff]   ;;  %v5079_v50 = vld [vmem:[%s6884_s6 + $0x1a0] ss:$20 sps:$4 sm:$0xff]  }
 0x252   : > { %2753 = vmatprep.subr.bf16.mxu0 %v4989_v30  ;;  %2839 = vmatprep.subr.bf16.mxu1 %v4992_v36  ;;  %v5059_v35 = vld [vmem:[%s6884_s6 + $0x4b0] ss:$20 sps:$4 sm:$0xff]   ;;  %v5062_v30 = vld [vmem:[%s6884_s6 + $0x4b8] ss:$20 sps:$4 sm:$0xff]   ;;  %v5084_v56 = vld [vmem:[%s6884_s6 + $0x448] ss:$20 sps:$4 sm:$0xff]  }
 0x253   : > { %2781 = vmatprep.mubr.bf16.mxu0 %v6217_v57  ;;  %2867 = vmatprep.mubr.bf16.mxu1 %v6217_v57  ;;  %v5067_v36 = vld [vmem:[%s6884_s6 + $0x4dc] ss:$20 sps:$4 sm:$0xff]  }
 0x255   : > { %2754 = vmatpush1.bf16.msra.mxu0 %v4987_v37  ;;  %2840 = vmatpush1.bf16.msra.mxu1 %v4990_v38  ;;  %v5070_v37 = vld [vmem:[%s6884_s6 + $0x4e4] ss:$20 sps:$4 sm:$0xff]  }
 0x256   : > { %2755 = vmatprep.subr.bf16.mxu0 %v4995_v39  ;;  %2841 = vmatprep.subr.bf16.mxu1 %v4998_v40  ;;  %v5065_v38 = vld [vmem:[%s6884_s6 + $0x4d8] ss:$20 sps:$4 sm:$0xff]   ;;  %v5068_v39 = vld [vmem:[%s6884_s6 + $0x4e0] ss:$20 sps:$4 sm:$0xff]   ;;  %v5071_v40 = vld [vmem:[%s6884_s6 + $0x150] ss:$20 sps:$4 sm:$0xff]  }
 0x259   : > { %2756 = vmatpush1.bf16.msra.mxu0 %v4993_v41  ;;  %2842 = vmatpush1.bf16.msra.mxu1 %v4996_v42  ;;  %v5072_v41 = vld [vmem:[%s6884_s6 + $0x3d0] ss:$20 sps:$4 sm:$0xff]  }
 0x25a   : > { %2757 = vmatprep.subr.bf16.mxu0 %v5001_v43  ;;  %2843 = vmatprep.subr.bf16.mxu1 %v5004_v45  ;;  %v5073_v42 = vld [vmem:[%s6884_s6 + $0x10] ss:$20 sps:$4 sm:$0xff]   ;;  %v5075_v45 = vld [vmem:[%s6884_s6 + $0x178] ss:$20 sps:$4 sm:$0xff]  }
 0x25b   : > { %v5074_v43 = vld [vmem:[%s6884_s6 + $0x290] ss:$20 sps:$4 sm:$0xff]  }
 0x25d   : > { %2758 = vmatpush1.bf16.msra.mxu0 %v4999_v47  ;;  %2844 = vmatpush1.bf16.msra.mxu1 %v5002_v49  ;;  %v5077_v47 = vld [vmem:[%s6884_s6 + $0x38] ss:$20 sps:$4 sm:$0xff]  }
 0x25e   : > { %2759 = vmatprep.subr.bf16.mxu0 %v5007_v51  ;;  %2845 = vmatprep.subr.bf16.mxu1 %v5010_v52  ;;  %v5078_v49 = vld [vmem:[%s6884_s6 + $0x2b8] ss:$20 sps:$4 sm:$0xff]   ;;  %v5081_v51 = vld [vmem:[%s6884_s6 + $0x60] ss:$20 sps:$4 sm:$0xff]  }
 0x25f   : > { %v5082_v52 = vld [vmem:[%s6884_s6 + $0x2e0] ss:$20 sps:$4 sm:$0xff]  }
 0x261   : > { %2760 = vmatpush1.bf16.msra.mxu0 %v5005_v58  ;;  %2846 = vmatpush1.bf16.msra.mxu1 %v5008_v60  ;;  %v5086_v58 = vld [vmem:[%s6884_s6 + $0x308] ss:$20 sps:$4 sm:$0xff]   ;;  %v5087_v60 = vld [vmem:[%s6884_s6 + $0x1f0] ss:$20 sps:$4 sm:$0xff]  }
 0x262   : > { %2761 = vmatprep.subr.bf16.mxu0 %v5013_v8  ;;  %2847 = vmatprep.subr.bf16.mxu1 %v5016_v61  ;;  %v5088_v8 = vld [vmem:[%s6884_s6 + $0x470] ss:$20 sps:$4 sm:$0xff]  }
 0x263   : > { %v5089_v61 = vld [vmem:[%s6884_s6 + $0xb0] ss:$20 sps:$4 sm:$0xff]  }
 0x265   : > { %2762 = vmatpush1.bf16.msra.mxu0 %v5011_v62  ;;  %2848 = vmatpush1.bf16.msra.mxu1 %v5014_v63  ;;  %v5090_v62 = vld [vmem:[%s6884_s6 + $0x330] ss:$20 sps:$4 sm:$0xff]   ;;  %v5091_v63 = vld [vmem:[%s6884_s6 + $0x218] ss:$20 sps:$4 sm:$0xff]  }
 0x266   : > { %2763 = vmatprep.subr.bf16.mxu0 %v5019_v9  ;;  %2849 = vmatprep.subr.bf16.mxu1 %v5022_v0  ;;  %v5092_v9 = vld [vmem:[%s6884_s6 + $0x498] ss:$20 sps:$4 sm:$0xff]  }
 0x267   : > { %v5093_v0 = vld [vmem:[%s6884_s6 + $0xd8] ss:$20 sps:$4 sm:$0xff]  }
 0x269   : > { %2764 = vmatpush1.bf16.msra.mxu0 %v5017_v1  ;;  %2850 = vmatpush1.bf16.msra.mxu1 %v5020_v2  ;;  %v5094_v1 = vld [vmem:[%s6884_s6 + $0x358] ss:$20 sps:$4 sm:$0xff]   ;;  %v5095_v2 = vld [vmem:[%s6884_s6 + $0x240] ss:$20 sps:$4 sm:$0xff]  }
 0x26a   : > { %2765 = vmatprep.subr.bf16.mxu0 %v5025_v3  ;;  %2851 = vmatprep.subr.bf16.mxu1 %v5028_v10  ;;  %v5096_v3 = vld [vmem:[%s6884_s6 + $0x4c0] ss:$20 sps:$4 sm:$0xff]  }
 0x26b   : > { %v5097_v10 = vld [vmem:[%s6884_s6 + $0x100] ss:$20 sps:$4 sm:$0xff]  }
 0x26d   : > { %2766 = vmatpush1.bf16.msra.mxu0 %v5023_v11  ;;  %2852 = vmatpush1.bf16.msra.mxu1 %v5026_v6  ;;  %v5098_v11 = vld [vmem:[%s6884_s6 + $0x380] ss:$20 sps:$4 sm:$0xff]   ;;  %v5099_v6 = vld [vmem:[%s6884_s6 + $0x268] ss:$20 sps:$4 sm:$0xff]  }
 0x26e   : > { %2767 = vmatprep.subr.bf16.mxu0 %v5031_v12  ;;  %2853 = vmatprep.subr.bf16.mxu1 %v5034_v13  ;;  %v5100_v12 = vld [vmem:[%s6884_s6 + $0x4e8] ss:$20 sps:$4 sm:$0xff]  }
 0x26f   : > { %v5101_v13 = vld [vmem:[%s6884_s6 + $0x128] ss:$20 sps:$4 sm:$0xff]  }
 0x271   : > { %2768 = vmatpush1.bf16.msra.mxu0 %v5029_v14  ;;  %2854 = vmatpush1.bf16.msra.mxu1 %v5032_v15  ;;  %v5102_v14 = vld [vmem:[%s6884_s6 + $0x3a8] ss:$20 sps:$4 sm:$0xff]   ;;  %v5281_v15 = vmov 0  }
 0x272   : > { %2769 = vmatprep.subr.bf16.mxu0 %v5037_v16  ;;  %2855 = vmatprep.subr.bf16.mxu1 %v5040_v17  ;;  %v5282_v16 = vmov 0.0   ;;  %v6456_v17 = vld [vmem:[%s6885_s7] sm:$0x1f] }
 0x275   : > { %2770 = vmatpush1.bf16.msra.mxu0 %v5035_v55  ;;  %2856 = vmatpush1.bf16.msra.mxu1 %v5038_v18  ;;  %v1856_v55 = vrot.slane %v6456_v17, %v5636_v7  ;;  %v1864_v18 = vrot.slane %v6456_v17, %v697_v48 }
 0x276   : > { %2771 = vmatprep.subr.bf16.mxu0 %v5043_v19  ;;  %2857 = vmatprep.subr.bf16.mxu1 %v5046_v20 }
 0x279   : > { %2772 = vmatpush1.bf16.msra.mxu0 %v5041_v21  ;;  %2858 = vmatpush1.bf16.msra.mxu1 %v5044_v59 }
 0x27a   : > { %2773 = vmatprep.subr.bf16.mxu0 %v5049_v22  ;;  %2859 = vmatprep.subr.bf16.mxu1 %v5052_v23 }
 0x27d   : > { %2774 = vmatpush1.bf16.msra.mxu0 %v5047_v24  ;;  %2860 = vmatpush1.bf16.msra.mxu1 %v5050_v25  ;;  %v2970_v24 = vld [vmem:[%s6886_s8] sm:$0xff] }
 0x27e   : > { %2775 = vmatprep.subr.bf16.mxu0 %v5055_v27  ;;  %2861 = vmatprep.subr.bf16.mxu1 %v5058_v29 }
 0x281   : > { %2776 = vmatpush1.bf16.msra.mxu0 %v5053_v31  ;;  %2862 = vmatpush1.bf16.msra.mxu1 %v5056_v32 }
 0x282   : > { %2777 = vmatprep.subr.bf16.mxu0 %v5061_v33  ;;  %2863 = vmatprep.subr.bf16.mxu1 %v5064_v34  ;;  %v2971_v33 = vld [vmem:[%s6886_s8 + $0x8] sm:$0xff]  ;;  %v2973_v34 = vld [vmem:[%s6886_s8 + $0x18] sm:$0xff] }
 0x285   : > { %2778 = vmatpush1.bf16.msra.mxu0 %v5059_v35  ;;  %2864 = vmatpush1.bf16.msra.mxu1 %v5062_v30 }
 0x286   : > { %2779 = vmatprep.subr.bf16.mxu0 %v5067_v36  ;;  %2865 = vmatprep.subr.bf16.mxu1 %v5070_v37 }
 0x289   : > { %2780 = vmatpush1.bf16.msra.mxu0 %v5065_v38  ;;  %2866 = vmatpush1.bf16.msra.mxu1 %v5068_v39 }
 0x28a   : > { %4582 = vmatprep.subr.bf16.mxu0 %v5071_v40  ;;  %4604 = vmatprep.subr.bf16.mxu1 %v5072_v41  ;;  %v2975_v40 = vld [vmem:[%s6886_s8 + $0x28] sm:$0x1]  ;;  %v2977_v41 = vld [vmem:[%s6886_s8 + $0x38] sm:$0x1] }
 0x28c   : > { %2782 = vmatmul.mubr.bf16.vlgmr.msra.gmra.mrb[40].mxu0 %v6215_v54  ;;  %2868 = vmatmul.mubr.bf16.vlgmr.msra.gmra.mrb[40].mxu1 %v6215_v54 }
 0x28d   : > { %4583 = vmatpush3.bf16.msra.mxu0 %v5073_v42  ;;  %2910 = vmatprep.mubr.bf16.mxu0 %v6149_v28  ;;  %v5080_v28 = vld [vmem:[%s6884_s6 + $0x420] ss:$20 sps:$4 sm:$0xff]  }
 0x28e   : > { %4605 = vmatpush3.bf16.msra.mxu1 %v5074_v43  ;;  %2951 = vmatprep.mubr.bf16.mxu1 %v6217_v57  ;;  %v5085_v57 = vld [vmem:[%s6884_s6 + $0x88] ss:$20 sps:$4 sm:$0xff]  }
 0x28f   : > { %4584 = vmatprep.subr.bf16.mxu0 %v5075_v45  ;;  %4606 = vmatprep.subr.bf16.mxu1 %v5076_v46 }
 0x291   : > { %4585 = vmatpush3.bf16.msra.mxu0 %v5077_v47  ;;  %v2976_v47 = vld [vmem:[%s6886_s8 + $0x30] sm:$0x1] }
 0x292   : > { %4607 = vmatpush3.bf16.msra.mxu1 %v5078_v49  ;;  %4586 = vmatprep.subr.bf16.mxu0 %v5079_v50  ;;  %v2978_v49 = vld [vmem:[%s6886_s8 + $0x40] sm:$0x1]  ;;  %v5284_v50 = vmov 65535  }
 0x293   : > { %4608 = vmatprep.subr.bf16.mxu1 %v5080_v28  ;;  %v3002_v28 = vsel %vm3000_vm3, 4294967295, %v5284_v50  ;;  %v5106_v50 = vld [vmem:[%s6888_s10 + $0xc0] sm:$0xff]  }
 0x295   : > { %4587 = vmatpush3.bf16.msra.mxu0 %v5081_v51 }
 0x296   : > { %4609 = vmatpush3.bf16.msra.mxu1 %v5082_v52  ;;  %4588 = vmatprep.subr.bf16.mxu0 %v5083_v53 }
 0x297   : > { %4610 = vmatprep.subr.bf16.mxu1 %v5084_v56 }
 0x299   : > { %4589 = vmatpush3.bf16.msra.mxu0 %v5085_v57 }
 0x29a   : > { %4611 = vmatpush3.bf16.msra.mxu1 %v5086_v58  ;;  %4590 = vmatprep.subr.bf16.mxu0 %v5087_v60 }
 0x29b   : > { %4612 = vmatprep.subr.bf16.mxu1 %v5088_v8 }
 0x29d   : > { %4591 = vmatpush3.bf16.msra.mxu0 %v5089_v61 }
 0x29e   : > { %4613 = vmatpush3.bf16.msra.mxu1 %v5090_v62  ;;  %4592 = vmatprep.subr.bf16.mxu0 %v5091_v63 }
 0x29f   : > { %4614 = vmatprep.subr.bf16.mxu1 %v5092_v9  ;;  %v6493_v9 = vsel %vm3001_vm4, %v3002_v28, 0  ;;  %v5127_v28 = vld [vmem:[%s6888_s10 + $0x30] sm:$0xff]  }
 0x2a1   : > { %4593 = vmatpush3.bf16.msra.mxu0 %v5093_v0 }
 0x2a2   : > { %4615 = vmatpush3.bf16.msra.mxu1 %v5094_v1  ;;  %4594 = vmatprep.subr.bf16.mxu0 %v5095_v2 }
 0x2a3   : > { %4616 = vmatprep.subr.bf16.mxu1 %v5096_v3 }
 0x2a5   : > { %4595 = vmatpush3.bf16.msra.mxu0 %v5097_v10 }
 0x2a6   : > { %4617 = vmatpush3.bf16.msra.mxu1 %v5098_v11  ;;  %4596 = vmatprep.subr.bf16.mxu0 %v5099_v6  ;;  %v6501_v6 = vld [vmem:[%s6887_s9] sm:$0x1] }
 0x2a7   : > { %4618 = vmatprep.subr.bf16.mxu1 %v5100_v12  ;;  %v5103_v12 = vld [vmem:[%s6888_s10 + $0x40] sm:$0xff]  }
 0x2a9   : > { %4597 = vmatpush3.bf16.msra.mxu0 %v5101_v13 }
 0x2aa   : > { %4619 = vmatpush3.bf16.msra.mxu1 %v5102_v14  ;;  %4699 = vmatprep.subr.bf16.mxu0 %v5282_v16  ;;  %v5104_v14 = vld [vmem:[%s6888_s10] sm:$0xff]  }
 0x2ac   : > { %2911 = vmatmul.mubr.bf16.vlgmr.msra.gmra.mrb[44].mxu0 %v6147_v26  ;;  %v1852_v26 = vrot.slane %v6456_v17, %v5630_v5 }
 0x2ad   : > { %2952 = vmatmul.mubr.bf16.vlgmr.msra.gmra.mrb[44].mxu1 %v6215_v54  ;;  %4701 = vmatprep.mubr.msk.bf16.mxu0 %vm5283_vm2, %v5282_v16  ;;  %v1860_v54 = vrot.slane %v6456_v17, %v693_v44  ;;  %v2972_v44 = vld [vmem:[%s6886_s8 + $0x10] sm:$0xff] }
 0x2ae   : > { %3051 = vmatprep.mubr.bf16.mxu1 %v5281_v15 }
 0x35f   : > { %v2783_v19 = vpop.f32.mrb[40].mxu0  ;;  %v2869_v20 = vpop.f32.mrb[40].mxu1 }
 0x360   : > { %v4717_v21 = vadd.f32 %v2783_v19, %v1852_v26  ;;  %v4721_v59 = vadd.f32 %v2869_v20, %v1860_v54  ;;  %v2785_v22 = vpop.f32.mrb[41].mxu0  ;;  %v2871_v23 = vpop.f32.mrb[41].mxu1  ;;  %v5111_v19 = vld [vmem:[%s6888_s10 + $0x10] sm:$0xff]  }
 0x361   : > { %v4718_v25 = vadd.f32 %v2785_v22, %v1856_v55  ;;  %v4722_v27 = vadd.f32 %v2871_v23, %v1864_v18  ;;  %v2787_v29 = vpop.f32.mrb[42].mxu0  ;;  %v2873_v31 = vpop.f32.mrb[42].mxu1 }
 0x362   : > { %v2960_v48 = vmax.f32 %v4717_v21, 0.0  ;;  %v2962_v32 = vmax.f32 %v4721_v59, 0.0  ;;  %v4719_v35 = vadd.f32 %v2787_v29, %v1852_v26  ;;  %v4723_v30 = vadd.f32 %v2873_v31, %v1860_v54  ;;  %v2789_v36 = vpop.f32.mrb[43].mxu0  ;;  %v2875_v37 = vpop.f32.mrb[43].mxu1  ;;  %v5105_v26 = vld [vmem:[%s6888_s10 + $0x48] sm:$0xff]   ;;  %v5113_v59 = vld [vmem:[%s6888_s10 + $0x58] sm:$0xff]  }
 0x363   : > { %v2961_v38 = vmax.f32 %v4718_v25, 0.0  ;;  %v2963_v39 = vmax.f32 %v4722_v27, 0.0  ;;  %v4720_v42 = vadd.f32 %v2789_v36, %v1856_v55  ;;  %v4724_v43 = vadd.f32 %v2875_v37, %v1864_v18  ;;  %v5107_v54 = vld [vmem:[%s6888_s10 + $0x8] sm:$0xff]   ;;  %v5109_v18 = vld [vmem:[%s6888_s10 + $0x50] sm:$0xff]   ;;  %v5115_v31 = vld [vmem:[%s6888_s10 + $0x18] sm:$0xff]  }
 0x364   : > { %v2965_v45 = vmax.f32 %v4719_v35, 0.0  ;;  %v2967_v46 = vmax.f32 %v4723_v30, 0.0  ;;  %v2980_v53 = vmul.f32 %v2970_v24, %v2960_v48  ;;  %v2982_v56 = vmul.f32 %v2972_v44, %v2962_v32  ;;  %v5119_v36 = vld [vmem:[%s6888_s10 + $0x20] sm:$0xff]  }
 0x365   : > { %v2966_v51 = vmax.f32 %v4720_v42, 0.0  ;;  %v2968_v52 = vmax.f32 %v4724_v43, 0.0  ;;  %v2981_v60 = vmul.f32 %v2971_v33, %v2961_v38  ;;  %v2983_v8 = vmul.f32 %v2973_v34, %v2963_v39  ;;  %v5117_v33 = vld [vmem:[%s6888_s10 + $0x60] sm:$0xff]   ;;  %v5121_v39 = vld [vmem:[%s6888_s10 + $0x68] sm:$0xff]  }
 0x366   : > { %v2985_v57 = vmul.f32 %v2975_v40, %v2965_v45  ;;  %v2987_v58 = vmul.f32 %v2977_v41, %v2967_v46  ;;  %v1867_v55 = vsub.s32 4, %v5627_v4  ;;  %v2974_v40 = vld [vmem:[%s6886_s8 + $0x20] sm:$0xff]  ;;  %v2979_v41 = vld [vmem:[%s6886_s8 + $0x48] sm:$0x1] }
 0x367   : > { %v2986_v61 = vmul.f32 %v2976_v47, %v2966_v51  ;;  %v2988_v62 = vmul.f32 %v2978_v49, %v2968_v52  ;;  %v5123_v43 = vld [vmem:[%s6888_s10 + $0x28] sm:$0xff]   ;;  %v5125_v47 = vld [vmem:[%s6888_s10 + $0x70] sm:$0xff]   ;;  %v5108_v52 = vld [vmem:[%s6888_s10 + $0x80] sm:$0xff]  }
 0x368   : > { %v2991_v63 = vpack.c.bf16 %v2985_v57, %v2980_v53  ;;  %v2993_v0 = vpack.c.bf16 %v2987_v58, %v2982_v56  ;;  %v1868_v21 = vrot.slane %v6456_v17, %v1867_v55  ;;  %v5110_v53 = vld [vmem:[%s6888_s10 + $0xc8] sm:$0xff]   ;;  %v5114_v57 = vld [vmem:[%s6888_s10 + $0xd0] sm:$0xff]  }
 0x369   : > { %v2992_v1 = vpack.c.bf16 %v2986_v61, %v2981_v60  ;;  %v2994_v2 = vpack.c.bf16 %v2988_v62, %v2983_v8  ;;  %v5112_v56 = vld [vmem:[%s6888_s10 + $0x88] sm:$0xff]   ;;  %v5116_v58 = vld [vmem:[%s6888_s10 + $0x90] sm:$0xff]   ;;  %v5118_v60 = vld [vmem:[%s6888_s10 + $0xd8] sm:$0xff]  }
 0x36a   : > { %v3005_v10 = vand.u32 %v6493_v9, %v2991_v63  ;;  %v3011_v13 = vand.u32 %v6493_v9, %v2993_v0  ;;  %v5120_v8 = vld [vmem:[%s6888_s10 + $0x98] sm:$0xff]   ;;  %v5122_v61 = vld [vmem:[%s6888_s10 + $0xe0] sm:$0xff]   ;;  %v5126_v63 = vld [vmem:[%s6888_s10 + $0xe8] sm:$0xff]  }
 0x36b   : > { %v3008_v3 = vand.u32 %v6493_v9, %v2992_v1  ;;  %v3014_v11 = vand.u32 %v6493_v9, %v2994_v2  ;;  %v5124_v62 = vld [vmem:[%s6888_s10 + $0xa0] sm:$0xff]   ;;  %v5129_v0 = vld [vmem:[%s6888_s10 + $0x78] sm:$0xff]   ;;  %v5130_v1 = vld [vmem:[%s6888_s10 + $0xf0] sm:$0xff]  }
 0x36c   : > { %v5131_v2 = vld [vmem:[%s6888_s10 + $0x38] sm:$0xff]  }
 0x36d   : > { %3019 = vmatprep.subr.bf16.mxu1 %v3008_v3  ;;  %v5132_v3 = vld [vmem:[%s6888_s10 + $0xb0] sm:$0xff]  }
 0x36e   : > { %3020 = vmatpush1.bf16.msra.mxu1 %v3005_v10  ;;  %v5133_v10 = vld [vmem:[%s6888_s10 + $0xf8] sm:$0xff]  }
 0x36f   : > { %3060 = vmatprep.subr.bf16.mxu1 %v3014_v11  ;;  %v5134_v11 = vld [vmem:[%s6888_s10 + $0xb8] sm:$0xff]  }
 0x371   : > { %4478 = vmatmul.mubr.msk.bf16.vlgmr.msra.gmra.mrb[48].mxu1 %vm2996_vm5, %v6501_v6 }
 0x372   : > { %3061 = vmatpush1.bf16.msra.mxu1 %v3011_v13  ;;  %3092 = vmatprep.mubr.bf16.mxu1 %v5281_v15 }
 0x373   : > { %4628 = vmatprep.subr.bf16.mxu1 %v5103_v12 }
 0x379   : > { %4479 = vmatmul.mubr.msk.bf16.vlgmr.msra.gmra.mrb[52].mxu1 %vm2996_vm5, %v6501_v6 }
 0x37a   : > { %4629 = vmatpush3.bf16.msra.mxu1 %v5104_v14 }
 0x37b   : > { %4630 = vmatprep.subr.bf16.mxu1 %v5105_v26 }
 0x37e   : > { %4631 = vmatpush3.bf16.msra.mxu1 %v5107_v54 }
 0x37f   : > { %v4598_v20 = vpop.f32.mrb[44].mxu0  ;;  %4632 = vmatprep.subr.bf16.mxu1 %v5109_v18  ;;  %v5135_v18 = vld [vmem:[%s6888_s10 + $0x100] sm:$0xff]  }
 0x380   : > { %v4620_v22 = vpop.f32.mrb[44].mxu1  ;;  %v4599_v4 = vpop.f32.mrb[45].mxu0 }
 0x381   : > { %v4600_v23 = vadd.f32 %v4599_v4, %v4598_v20  ;;  %v4621_v24 = vpop.f32.mrb[45].mxu1  ;;  %v4601_v44 = vpop.f32.mrb[46].mxu0  ;;  %v5136_v20 = vld [vmem:[%s6888_s10 + $0x108] sm:$0xff]  }
 0x382   : > { %v4622_v25 = vadd.f32 %v4621_v24, %v4620_v22  ;;  %v4623_v27 = vpop.f32.mrb[46].mxu1  ;;  %v4602_v29 = vpop.f32.mrb[47].mxu0  ;;  %4633 = vmatpush3.bf16.msra.mxu1 %v5111_v19 }
 0x383   : > { %v2913_v48 = vadd.f32 %v4600_v23, %v1868_v21  ;;  %v4603_v17 = vadd.f32 %v4602_v29, %v4601_v44  ;;  %v4624_v32 = vpop.f32.mrb[47].mxu1  ;;  %4634 = vmatprep.subr.bf16.mxu1 %v5113_v59  ;;  %v5137_v44 = vld [vmem:[%s6888_s10 + $0x110] sm:$0xff]   ;;  %v5143_v29 = vld [vmem:[%s6893_s15 + $0x4] ss:$8 sps:$4 sm:$0xff]  }
 0x384   : > { %v4625_v34 = vadd.f32 %v4624_v32, %v4623_v27  ;;  %v5146_v32 = vld [vmem:[%s6893_s15 + $0x14] ss:$8 sps:$4 sm:$0xff]  }
 0x385   : > { %v2954_v35 = vadd.f32 %v4622_v25, %v2913_v48  ;;  %v2916_v30 = vadd.f32 %v4603_v17, %v1868_v21  ;;  %v3559_v48 = vld [vmem:[%s613_s3] sm:$0x1]  ;;  %s604_s3 = sand.u32 1, %s5271_s30  }
 0x386   : > { %4635 = vmatpush3.bf16.msra.mxu1 %v5115_v31  ;;  %v5140_v31 = vld [vmem:[%s6888_s10 + $0x118] sm:$0xff]   ;;  %v5141_v17 = vld [vmem:[%s6893_s15] ss:$8 sps:$4 sm:$0xff]   ;;  %s605_s0 = scalar_lea.vmem [#allocation2], %s604_s3  ;;  %s4149_s20 = scalar_lea.sflag [#allocation3], %s604_s3 }
 0x387   : > { %v2964_v37 = vmax.f32 %v2954_v35, 0.0  ;;  %v2957_v38 = vadd.f32 %v4625_v34, %v2916_v30  ;;  %4636 = vmatprep.subr.bf16.mxu1 %v5117_v33  ;;  %v5149_v33 = vld [vmem:[%s6893_s15 + $0x24] ss:$8 sps:$4 sm:$0xff]   ;;  %v5147_v34 = vld [vmem:[%s6893_s15 + $0x20] ss:$8 sps:$4 sm:$0xff]   ;;  %s4161_s2 = sshll.u32 %s605_s0, 4  ;;  %s6838_s2 = int_to_ptr.vmem [resolvable:$true] %s4161_s2 }
 0x388   : > { %v5152_v35 = vld [vmem:[%s6893_s15 + $0x34] ss:$8 sps:$4 sm:$0xff]   ;;  %v5150_v30 = vld [vmem:[%s6893_s15 + $0x30] ss:$8 sps:$4 sm:$0xff]   ;;  %s5217_s1 = scalar_lea.vmem %s6838_s2, 16  ;;  %p5224_p0 = scmp.lt.s32.totalorder %s6838_s2, %s5222_s22 }
 0x389   : > { %v2969_v42 = vmax.f32 %v2957_v38, 0.0  ;;  %v2984_v45 = vmul.f32 %v2974_v40, %v2964_v37  ;;  %v5153_v37 = vld [vmem:[%s6893_s15 + $0x40] ss:$8 sps:$4 sm:$0xff]   ;;  %p5218_p11 = scmp.ne.s32.totalorder %s6838_s2, %s5217_s1  ;;  %p5225_p1 = scmp.lt.s32.totalorder %s5223_s25, %s5217_s1 }
 0x38a   : > { %4637 = vmatpush3.bf16.msra.mxu1 %v5119_v36  ;;  %v5155_v36 = vld [vmem:[%s6893_s15 + $0x44] ss:$8 sps:$4 sm:$0xff]  }
 0x38b   : > { %v2989_v46 = vmul.f32 %v2979_v41, %v2969_v42  ;;  %4638 = vmatprep.subr.bf16.mxu1 %v5121_v39  ;;  %v5158_v39 = vld [vmem:[%s6893_s15 + $0x54] ss:$8 sps:$4 sm:$0xff]   ;;  %p5219_p12 = pnand %p5218_p11, %p5424_p5  ;;  %p5226_p2 = por %p5225_p1, %p5224_p0 }
 0x38d   : > { %v2995_v49 = vpack.c.bf16 %v2989_v46, %v2984_v45  ;;  %v5156_v45 = vld [vmem:[%s6893_s15 + $0x50] ss:$8 sps:$4 sm:$0xff]   ;;  %v5161_v46 = vld [vmem:[%s6893_s15 + $0x64] ss:$8 sps:$4 sm:$0xff]   ;;  %p5220_p13 = pneg %p5219_p12 }
 0x38e   : > { %4639 = vmatpush3.bf16.msra.mxu1 %v5123_v43 }
 0x38f   : > { %v3017_v51 = vand.u32 %v6493_v9, %v2995_v49  ;;  %4640 = vmatprep.subr.bf16.mxu1 %v5125_v47  ;;  %v5128_v9 = vld [vmem:[%s6888_s10 + $0xa8] sm:$0xff]   ;;  %v5164_v49 = vld [vmem:[%s6893_s15 + $0x74] ss:$8 sps:$4 sm:$0xff]   ;;  %p5227_p3 = pnand %p5226_p2, %p5220_p13 }
 0x390   : > { %v5159_v47 = vld [vmem:[%s6893_s15 + $0x60] ss:$8 sps:$4 sm:$0xff]  }
 0x391   : > { %4700 = vmatpush3.bf16.msra.mxu0 %v3017_v51  ;;  %v5170_v51 = vld [vmem:[%s6893_s15 + $0x94] ss:$8 sps:$4 sm:$0xff]  }
 0x392   : > { %4650 = vmatprep.subr.bf16.mxu0 %v5106_v50  ;;  %4641 = vmatpush3.bf16.msra.mxu1 %v5127_v28  ;;  %v5162_v50 = vld [vmem:[%s6893_s15 + $0x70] ss:$8 sps:$4 sm:$0xff]   ;;  %v5165_v28 = vld [vmem:[%s6893_s15 + $0x80] ss:$8 sps:$4 sm:$0xff]  }
 0x393   : > { %4642 = vmatprep.subr.bf16.mxu1 %v5129_v0  ;;  %v5186_v0 = vld [vmem:[%s6892_s14 + $0x10] ss:$8 sps:$4 sm:$0xff]  }
 0x394   : > { %4702 = vmatmul.mubr.msk.bf16.vlgmr.msra.gmra.mrb[48].mxu0 %vm2996_vm5, %v6501_v6  ;;  %v3560_v6 = vld [vmem:[%s6890_s12] sm:$0xff] }
 0x395   : > { %4651 = vmatpush3.bf16.msra.mxu0 %v5108_v52  ;;  %v4519_v12 = vcombine.high %v3560_v6, %v3560_v6  ;;  %v4518_v21 = vcombine.low %v3560_v6, %v3560_v6  ;;  %v5168_v52 = vld [vmem:[%s6893_s15 + $0x90] ss:$8 sps:$4 sm:$0xff]   ;;  %v5197_v6 = vld [vmem:[%s6893_s15 + $0xf4] ss:$8 sps:$4 sm:$0xff]  }
 0x396   : > { %4652 = vmatprep.subr.bf16.mxu0 %v5110_v53  ;;  %4643 = vmatpush3.bf16.msra.mxu1 %v5131_v2  ;;  %v5171_v53 = vld [vmem:[%s6893_s15 + $0xa0] ss:$8 sps:$4 sm:$0xff]  }
 0x397   : > { %4705 = vmatprep.subr.bf16.mxu1 %v5282_v16  ;;  %v3583_v27 = vsel %vm3000_vm3, %v4518_v21, 0  ;;  %v5189_v2 = vld [vmem:[%s6893_s15 + $0xe0] ss:$8 sps:$4 sm:$0xff]  }
 0x398   : > { %v3218_v21 = vld [vmem:[%s6889_s11] sm:$0x1] }
 0x399   : > { %4653 = vmatpush3.bf16.msra.mxu0 %v5112_v56  ;;  %v5173_v56 = vld [vmem:[%s6893_s15 + $0xa4] ss:$8 sps:$4 sm:$0xff]  }
 0x39a   : > { %4654 = vmatprep.subr.bf16.mxu0 %v5114_v57  ;;  %v5174_v57 = vld [vmem:[%s6893_s15 + $0xb0] ss:$8 sps:$4 sm:$0xff]  }
 0x39d   : > { %4655 = vmatpush3.bf16.msra.mxu0 %v5116_v58  ;;  %v5176_v58 = vld [vmem:[%s6893_s15 + $0xb4] ss:$8 sps:$4 sm:$0xff]  }
 0x39e   : > { %4656 = vmatprep.subr.bf16.mxu0 %v5118_v60  ;;  %v5179_v60 = vld [vmem:[%s6893_s15 + $0xc4] ss:$8 sps:$4 sm:$0xff]  }
 0x3a1   : > { %4657 = vmatpush3.bf16.msra.mxu0 %v5120_v8  ;;  %v5180_v8 = vld [vmem:[%s6892_s14] ss:$8 sps:$4 sm:$0xff]  }
 0x3a2   : > { %4658 = vmatprep.subr.bf16.mxu0 %v5122_v61  ;;  %v5182_v61 = vld [vmem:[%s6892_s14 + $0x4] ss:$8 sps:$4 sm:$0xff]  }
 0x3a5   : > { %4659 = vmatpush3.bf16.msra.mxu0 %v5124_v62  ;;  %v5177_v62 = vld [vmem:[%s6893_s15 + $0xc0] ss:$8 sps:$4 sm:$0xff]  }
 0x3a6   : > { %4660 = vmatprep.subr.bf16.mxu0 %v5126_v63  ;;  %v5188_v63 = vld [vmem:[%s6892_s14 + $0x14] ss:$8 sps:$4 sm:$0xff]  }
 0x3a9   : > { %4661 = vmatpush3.bf16.msra.mxu0 %v5128_v9  ;;  %v5185_v9 = vld [vmem:[%s6893_s15 + $0xd4] ss:$8 sps:$4 sm:$0xff]  }
 0x3aa   : > { %4662 = vmatprep.subr.bf16.mxu0 %v5130_v1  ;;  %v5183_v1 = vld [vmem:[%s6893_s15 + $0xd0] ss:$8 sps:$4 sm:$0xff]  }
 0x3ad   : > { %4663 = vmatpush3.bf16.msra.mxu0 %v5132_v3  ;;  %v5191_v3 = vld [vmem:[%s6893_s15 + $0xe4] ss:$8 sps:$4 sm:$0xff]  }
 0x3ae   : > { %4664 = vmatprep.subr.bf16.mxu0 %v5133_v10  ;;  %v5192_v10 = vld [vmem:[%s6892_s14 + $0x20] ss:$8 sps:$4 sm:$0xff]  }
 0x3b1   : > { %4665 = vmatpush3.bf16.msra.mxu0 %v5134_v11  ;;  %v5194_v11 = vld [vmem:[%s6892_s14 + $0x24] ss:$8 sps:$4 sm:$0xff]  }
 0x3b2   : > { %4520 = vmatprep.subr.msk.bf16.mxu0 %vm3000_vm3, %v4519_v12  ;;  %v5195_v12 = vld [vmem:[%s6893_s15 + $0xf0] ss:$8 sps:$4 sm:$0xff]  }
 0x444   : > { %v3053_v13 = vpop.f32.mrb[48].mxu1 }
 0x445   : > { %v3141_v14 = vpack.c.bf16 %v3053_v13, %v3053_v13  ;;  %v3055_v26 = vpop.f32.mrb[49].mxu1  ;;  %v5200_v13 = vld [vmem:[%s6892_s14 + $0x34] ss:$8 sps:$4 sm:$0xff]  }
 0x446   : > { %v3142_v54 = vpack.c.bf16 %v3055_v26, %v3055_v26  ;;  %v3057_v55 = vpop.f32.mrb[50].mxu1  ;;  %v5201_v26 = vld [vmem:[%s6895_s17 + $0x40] sm:$0xff]  }
 0x447   : > { %v3058_v19 = vpop.f32.mrb[51].mxu1 }
 0x448   : > { %3470 = vmatprep.mubr.bf16.mxu1 %v3142_v54 }
 0x449   : > { %3471 = vmatmul.mubr.bf16.vlgmr.msra.gmra.mrb[56].mxu1 %v3141_v14  ;;  %v5198_v14 = vld [vmem:[%s6892_s14 + $0x30] ss:$8 sps:$4 sm:$0xff]  }
 0x44a   : > { %4706 = vmatpush3.bf16.msra.mxu1 %v5135_v18  ;;  %4713 = vmatprep.mubr.msk.bf16.mxu1 %vm5283_vm2, %v5282_v16 }
 0x44b   : > { %4707 = vmatprep.subr.bf16.mxu1 %v5282_v16 }
 0x44c   : > { %v3094_v59 = vpop.f32.mrb[52].mxu1 }
 0x44d   : > { %v3143_v22 = vpack.c.bf16 %v3094_v59, %v3094_v59  ;;  %v3096_v4 = vpop.f32.mrb[53].mxu1 }
 0x44e   : > { %v3144_v23 = vpack.c.bf16 %v3096_v4, %v3096_v4  ;;  %v3098_v24 = vpop.f32.mrb[54].mxu1  ;;  %4708 = vmatpush3.bf16.msra.mxu1 %v5136_v20 }
 0x44f   : > { %v3099_v25 = vpop.f32.mrb[55].mxu1  ;;  %4709 = vmatprep.subr.bf16.mxu1 %v5282_v16 }
 0x450   : > { %3510 = vmatprep.mubr.bf16.mxu0 %v3144_v23 }
 0x451   : > { %3511 = vmatmul.mubr.bf16.vlgmr.msra.gmra.mrb[52].mxu0 %v3143_v22 }
 0x452   : > { %4710 = vmatpush3.bf16.msra.mxu1 %v5137_v44  ;;  %3589 = vmatpush1.bf16.msra.mxu0 %v3583_v27  ;;  %v3561_v44 = vld [vmem:[%s6891_s13] sm:$0x3] }
 0x453   : > { %4711 = vmatprep.subr.bf16.mxu1 %v5282_v16  ;;  %3620 = vmatprep.mubr.bf16.mxu0 %v5281_v15  ;;  %v5144_v16 = vld [vmem:[%s6893_s15 + $0x10] ss:$8 sps:$4 sm:$0xff]  }
 0x454   : > { %3834 = vmatprep.subr.bf16.mxu0 %v5143_v29  ;;  %v3571_v29 = vrot.slane %v3561_v44, %v5630_v5 }
 0x456   : > { %4712 = vmatpush3.bf16.msra.mxu1 %v5140_v31  ;;  %v3575_v31 = vrot.slane %v3561_v44, %v5636_v7 }
 0x457   : > { %3918 = vmatprep.subr.bf16.mxu1 %v5182_v61  ;;  %v5216_v61 = vld [vmem:[%s6895_s17 + $0x38] sm:$0xff]  }
 0x459   : > { %4521 = vmatmul.mubr.msk.bf16.vlgmr.msra.gmra.mrb[56].mxu0 %vm3578_vm6, %v3559_v48 }
 0x45a   : > { %3835 = vmatpush1.bf16.msra.mxu0 %v5141_v17 }
 0x45b   : > { %3836 = vmatprep.subr.bf16.mxu0 %v5146_v32 }
 0x45e   : > { %3837 = vmatpush1.bf16.msra.mxu0 %v5144_v16 }
 0x45f   : > { %3838 = vmatprep.subr.bf16.mxu0 %v5149_v33 }
 0x462   : > { %3839 = vmatpush1.bf16.msra.mxu0 %v5147_v34 }
 0x463   : > { %3840 = vmatprep.subr.bf16.mxu0 %v5152_v35 }
 0x466   : > { %3841 = vmatpush1.bf16.msra.mxu0 %v5150_v30 }
 0x467   : > { %v3135_v38 = vpop.f32.mrb[48].mxu0  ;;  %3842 = vmatprep.subr.bf16.mxu0 %v5155_v36 }
 0x468   : > { %v3145_v40 = vpack.c.bf16 %v3135_v38, %v3135_v38  ;;  %v4703_v41 = vpop.f32.mrb[49].mxu0 }
 0x469   : > { %v3138_v42 = vpop.f32.mrb[50].mxu0 }
 0x46a   : > { %4714 = vmatmul.mubr.msk.bf16.vlgmr.msra.gmra.mrb[60].mxu1 %vm1024_vm0, %v3145_v40  ;;  %v4704_v43 = vpop.f32.mrb[51].mxu0  ;;  %3843 = vmatpush1.bf16.msra.mxu0 %v5153_v37 }
 0x46b   : > { %3844 = vmatprep.subr.bf16.mxu0 %v5158_v39  ;;  %3950 = vmatprep.mubr.bf16.mxu1 %v5281_v15  ;;  %v5167_v15 = vld [vmem:[%s6893_s15 + $0x84] ss:$8 sps:$4 sm:$0xff]  }
 0x46c   : > { %3919 = vmatpush1.bf16.msra.mxu1 %v5180_v8  ;;  %v5215_v8 = vld [vmem:[%s6895_s17 + $0x78] sm:$0xff]  }
 0x46d   : > { %3920 = vmatprep.subr.bf16.mxu1 %v5188_v63 }
 0x46e   : > { %3845 = vmatpush1.bf16.msra.mxu0 %v5156_v45  ;;  %v5202_v45 = vld [vmem:[%s6895_s17] sm:$0xff]  }
 0x46f   : > { %3846 = vmatprep.subr.bf16.mxu0 %v5161_v46 }
 0x470   : > { %3921 = vmatpush1.bf16.msra.mxu1 %v5186_v0 }
 0x471   : > { %3922 = vmatprep.subr.bf16.mxu1 %v5194_v11 }
 0x472   : > { %3847 = vmatpush1.bf16.msra.mxu0 %v5159_v47  ;;  %v5203_v47 = vld [vmem:[%s6895_s17 + $0x48] sm:$0xff]  }
 0x473   : > { %3848 = vmatprep.subr.bf16.mxu0 %v5164_v49  ;;  %v5204_v49 = vld [vmem:[%s6895_s17 + $0x8] sm:$0xff]  }
 0x474   : > { %3923 = vmatpush1.bf16.msra.mxu1 %v5192_v10 }
 0x475   : > { %3924 = vmatprep.subr.bf16.mxu1 %v5200_v13 }
 0x476   : > { %3849 = vmatpush1.bf16.msra.mxu0 %v5162_v50  ;;  %v5205_v50 = vld [vmem:[%s6895_s17 + $0x50] sm:$0xff]  }
 0x477   : > { %3850 = vmatprep.subr.bf16.mxu0 %v5167_v15  ;;  %v5206_v15 = vld [vmem:[%s6895_s17 + $0x10] sm:$0xff]  }
 0x478   : > { %3925 = vmatpush1.bf16.msra.mxu1 %v5198_v14 }
 0x479   : > { %4677 = vmatprep.subr.bf16.mxu1 %v5201_v26 }
 0x47a   : > { %3851 = vmatpush1.bf16.msra.mxu0 %v5165_v28  ;;  %v5207_v28 = vld [vmem:[%s6895_s17 + $0x58] sm:$0xff]  }
 0x47b   : > { %3852 = vmatprep.subr.bf16.mxu0 %v5170_v51  ;;  %v5208_v51 = vld [vmem:[%s6895_s17 + $0x18] sm:$0xff]  }
 0x47e   : > { %3853 = vmatpush1.bf16.msra.mxu0 %v5168_v52  ;;  %v5209_v52 = vld [vmem:[%s6895_s17 + $0x60] sm:$0xff]  }
 0x47f   : > { %3854 = vmatprep.subr.bf16.mxu0 %v5173_v56  ;;  %v5211_v56 = vld [vmem:[%s6895_s17 + $0x68] sm:$0xff]  }
 0x482   : > { %3855 = vmatpush1.bf16.msra.mxu0 %v5171_v53  ;;  %v5210_v53 = vld [vmem:[%s6895_s17 + $0x20] sm:$0xff]  }
 0x483   : > { %3856 = vmatprep.subr.bf16.mxu0 %v5176_v58  ;;  %v5213_v58 = vld [vmem:[%s6895_s17 + $0x70] sm:$0xff]  }
 0x486   : > { %3857 = vmatpush1.bf16.msra.mxu0 %v5174_v57  ;;  %v5212_v57 = vld [vmem:[%s6895_s17 + $0x28] sm:$0xff]  }
 0x487   : > { %3858 = vmatprep.subr.bf16.mxu0 %v5179_v60  ;;  %v5214_v60 = vld [vmem:[%s6895_s17 + $0x30] sm:$0xff]  }
 0x48a   : > { %3859 = vmatpush1.bf16.msra.mxu0 %v5177_v62 }
 0x48b   : > { %3860 = vmatprep.subr.bf16.mxu0 %v5185_v9 }
 0x48e   : > { %3861 = vmatpush1.bf16.msra.mxu0 %v5183_v1  ;;  %v3959_v1 = vld [vmem:[%s6894_s16] sm:$0x3] }
 0x48f   : > { %3862 = vmatprep.subr.bf16.mxu0 %v5191_v3  ;;  %v3968_v10 = vrot.slane %v3959_v1, %v5636_v7  ;;  %v4009_v7 = vld [vmem:[%s6896_s18] sm:$0x1] }
 0x492   : > { %3863 = vmatpush1.bf16.msra.mxu0 %v5189_v2  ;;  %v3964_v2 = vrot.slane %v3959_v1, %v5630_v5 }
 0x493   : > { %3864 = vmatprep.subr.bf16.mxu0 %v5197_v6 }
 0x496   : > { %3865 = vmatpush1.bf16.msra.mxu0 %v5195_v12 }
 0x51c   : > { %v4644_v54 = vpop.f32.mrb[56].mxu1 }
 0x51d   : > { %v4645_v55 = vpop.f32.mrb[57].mxu1 }
 0x51e   : > { %v4646_v18 = vadd.f32 %v4645_v55, %v4644_v54  ;;  %v4647_v19 = vpop.f32.mrb[58].mxu1 }
 0x51f   : > { %v4648_v20 = vpop.f32.mrb[59].mxu1 }
 0x520   : > { %v3473_v59 = vadd.f32 %v4646_v18, %v3218_v21 }
 0x524   : > { %v4666_v22 = vpop.f32.mrb[52].mxu0 }
 0x525   : > { %v4667_v4 = vpop.f32.mrb[53].mxu0 }
 0x526   : > { %v4668_v23 = vadd.f32 %v4667_v4, %v4666_v22  ;;  %v4669_v24 = vpop.f32.mrb[54].mxu0 }
 0x527   : > { %v4670_v25 = vpop.f32.mrb[55].mxu0 }
 0x528   : > { %v3513_v27 = vadd.f32 %v4668_v23, %v3473_v59 }
 0x52c   : > { %v3622_v48 = vpop.f32.mrb[56].mxu0 }
 0x52d   : > { %v3623_v17 = vadd.f32 %v3622_v48, %v3571_v29  ;;  %v3624_v32 = vpop.f32.mrb[57].mxu0 }
 0x52e   : > { %v3625_v16 = vadd.f32 %v3624_v32, %v3575_v31  ;;  %v3626_v33 = vpop.f32.mrb[58].mxu0 }
 0x52f   : > { %v3629_v34 = vmax.f32 %v3623_v17, 0.0  ;;  %v3627_v35 = vpop.f32.mrb[59].mxu0 }
 0x530   : > { %v3630_v30 = vmax.f32 %v3625_v16, 0.0 }
 0x531   : > { %v3640_v36 = vpack.c.bf16 %v3629_v34, %v3629_v34 }
 0x532   : > { %v3641_v37 = vpack.c.bf16 %v3630_v30, %v3630_v30 }
 0x534   : > { %3866 = vmatprep.mubr.bf16.mxu0 %v3641_v37 }
 0x535   : > { %3867 = vmatmul.mubr.bf16.vlgmr.msra.gmra.mrb[60].mxu0 %v3640_v36 }
 0x53d   : > { %v3552_v38 = vpop.f32.mrb[60].mxu1 }
 0x53e   : > { %v3553_v39 = vadd.f32 %v3552_v38, %v3513_v27  ;;  %v4715_v40 = vpop.f32.mrb[61].mxu1 }
 0x53f   : > { %v3555_v41 = vpop.f32.mrb[62].mxu1 }
 0x540   : > { %v3558_v42 = vmax.f32 %v3553_v39, 0.0  ;;  %v4716_v43 = vpop.f32.mrb[63].mxu1 }
 0x542   : > { %v3631_v46 = vpack.c.bf16 %v3558_v42, %v3558_v42 }
 0x544   : > { %4562 = vmatmul.mubr.msk.bf16.vlgmr.msra.gmra.mrb[64].mxu1 %vm1024_vm0, %v3631_v46 }
 0x545   : > { %4678 = vmatpush3.bf16.msra.mxu1 %v5202_v45 }
 0x546   : > { %4679 = vmatprep.subr.bf16.mxu1 %v5203_v47 }
 0x549   : > { %4680 = vmatpush3.bf16.msra.mxu1 %v5204_v49 }
 0x54a   : > { %4681 = vmatprep.subr.bf16.mxu1 %v5205_v50 }
 0x54d   : > { %4682 = vmatpush3.bf16.msra.mxu1 %v5206_v15 }
 0x54e   : > { %4683 = vmatprep.subr.bf16.mxu1 %v5207_v28 }
 0x551   : > { %4684 = vmatpush3.bf16.msra.mxu1 %v5208_v51 }
 0x552   : > { %4685 = vmatprep.subr.bf16.mxu1 %v5209_v52 }
 0x555   : > { %4686 = vmatpush3.bf16.msra.mxu1 %v5210_v53 }
 0x556   : > { %4687 = vmatprep.subr.bf16.mxu1 %v5211_v56 }
 0x559   : > { %4688 = vmatpush3.bf16.msra.mxu1 %v5212_v57 }
 0x55a   : > { %4689 = vmatprep.subr.bf16.mxu1 %v5213_v58 }
 0x55d   : > { %4690 = vmatpush3.bf16.msra.mxu1 %v5214_v60 }
 0x55e   : > { %4691 = vmatprep.subr.bf16.mxu1 %v5215_v8 }
 0x561   : > { %4692 = vmatpush3.bf16.msra.mxu1 %v5216_v61 }
 0x608   : > { %v3868_v62 = vpop.f32.mrb[60].mxu0 }
 0x609   : > { %v3870_v63 = vpop.f32.mrb[61].mxu0 }
 0x60a   : > { %v3872_v9 = vpop.f32.mrb[62].mxu0 }
 0x60b   : > { %v3873_v0 = vpop.f32.mrb[63].mxu0 }
 0x617   : > { %v3952_v3 = vpop.f32.mrb[64].mxu1 }
 0x618   : > { %v3953_v11 = vadd.f32 %v3952_v3, %v3868_v62  ;;  %v3954_v6 = vpop.f32.mrb[65].mxu1 }
 0x619   : > { %v3955_v12 = vadd.f32 %v3954_v6, %v3870_v63  ;;  %v3956_v13 = vpop.f32.mrb[66].mxu1 }
 0x61a   : > { %v3971_v14 = vadd.f32 %v3964_v2, %v3953_v11  ;;  %v3957_v26 = vpop.f32.mrb[67].mxu1 }
 0x61b   : > { %v3972_v54 = vadd.f32 %v3968_v10, %v3955_v12 }
 0x61c   : > { %v3973_v55 = vmax.f32 %v3971_v14, 0.0 }
 0x61d   : > { %v3974_v18 = vmax.f32 %v3972_v54, 0.0 }
 0x61e   : > { %v3975_v20 = vpack.c.bf16 %v3973_v55, %v3973_v55 }
 0x61f   : > { %v3976_v19 = vpack.c.bf16 %v3974_v18, %v3974_v18 }
 0x621   : > { %4138 = vmatprep.mubr.bf16.mxu1 %v3976_v19 }
 0x622   : > { %4139 = vmatmul.mubr.bf16.vlgmr.msra.gmra.mrb[68].mxu1 %v3975_v20 }
 0x6f5   : > { %v4693_v5 = vpop.f32.mrb[68].mxu1 }
 0x6f6   : > { %v4694_v21 = vpop.f32.mrb[69].mxu1 }
 0x6f7   : > { %v4695_v59 = vadd.f32 %v4694_v21, %v4693_v5  ;;  %v4696_v22 = vpop.f32.mrb[70].mxu1 }
 0x6f8   : > { %v4697_v4 = vpop.f32.mrb[71].mxu1 }
 0x6f9   : > { %v4141_v23 = vadd.f32 %v4695_v59, %v4009_v7 }
 0x6fb   : > { %4147 = vst.msk [vmem:[%s605_s0] sm:$0x1] %vm4146_vm7, %v4141_v23 }
 0x6fc   : > { %5230 = shalt.err (!%p5227_p3)
}
 0x6fd   : > { %s5231_s3 = scalar_lea.hbm %s6836_s21, 16  ;;  %s5235_s26 = scalar_lea.hbm %s6927_s19, 32 }
 0x6fe   : > { %p5232_p4 = scmp.ne.s32.totalorder %s6836_s21, %s5231_s3  ;;  %p5236_p9 = scmp.lt.u32.totalorder %s6836_s21, %s6927_s19 }
 0x6ff   : > { %p5237_p10 = scmp.lt.u32.totalorder %s5235_s26, %s5231_s3  ;;  %p5239_p12 = scmp.lt.u32.totalorder %s5231_s3, %s6836_s21 }
 0x700   : > { %p5233_p7 = pnand %p5232_p4, %p5424_p5 }
 0x701   : > { %p5238_p11 = por %p5237_p10, %p5236_p9 }
 0x702   : > { %p5234_p8 = pneg %p5233_p7 }
 0x703   : > { %p5240_p13 = por %p5239_p12, %p5238_p11 }
 0x705   : > { %p5241_p0 = pnand %p5240_p13, %p5234_p8 }
 0x707   : > { %5244 = shalt.err (!%p5241_p0)
}
 0x708   : > { %4734 = dma.vmem_to_hbm [thread:$0]  (%p5424_p5), %s6838_s2, 16, %s6836_s21, %s4149_s20  }
 0x709 PF: > { %s6928_s1 = sld [smem:[#allocation7_spill]]  ;;  %s6929_s22 = sld [smem:[#allocation5_spill]] }
 0x70f   : > { %p4740_p1 = scmp.ge.s32.totalorder %s6928_s1, 2  ;;  %s4173_s23 = sand.u32 1, %s6929_s22  }
 0x710   : > { %s4174_s0 = scalar_lea.sflag [#allocation3], %s4173_s23 }
 0x711   : > { %p4737_p2 = pnand %p4740_p1, %p5428_p6 }
 0x713   : > { %5262 = dma.done.wait (!%p4737_p2), %s4174_s0, 16  }
 0x714   : > { %5264 = vsyncadd (!%p4737_p2), %s4174_s0, 4294967280  ;;  %s6931_s21 = sld [smem:[#allocation8_spill]]  ;;  %s6932_s3 = sld [smem:[#allocation6_spill]] }
 0x715   : > { %s6933_s20 = sld [smem:[#allocation9_spill]]  ;;  %s6934_s0 = smov %s5271_s30 }
 0x71a   : > { %p29_p3 = scmp.ge.s32.totalorder %s6931_s21, 4   ;;  %s6935_s30 = smov %s6932_s3 }
 0x71c   :  { %31 = sbr.rel (!%p29_p3) target bundleno = 9 (0x9), region = 134 }
 0x723   :  { %4178 = vsyncpa [#allocation3], 1 }
 0x724   :  { %4180 = vsyncpa [#allocation3 + $0x1], 1 }

</bundles_post_ra>
